<compile_context>
chip_gen: v7x
topology: tpu7x:2x2x1
jax: 0.10.0
libtpu: 0.0.40
codegen_flags: <defaults>
</compile_context>

<pallas_src>
import math

import jax
import jax.numpy as jnp
from jax import lax
from jax.experimental import pallas as pl
from jax.experimental.pallas import tpu as pltpu

_EPS = 1e-5
_SLOPE = 0.01  # LeakyReLU default


# ----------------------------------------------------------------------------
# Packed parameter layout (built once by pack_params):
#   enc  (9, 512)  f32 : rows 0..2 = [g0_y*W1[0], g0_x*W1[1],
#                                     b1 + be0_y*W1[0] + be0_x*W1[1]]
#                        rows 3..8 = [g1, be1, b2|0, g2|0, be2|0, b3|0]
#                        (rows 3..7 also sit in the layer-1 MXU RHS but always
#                         meet zero LHS columns, so they contribute nothing)
#   w2   (512,256) bf16: W2 zero-padded from 150 to 256 output channels
#   w3   (256,128) bf16: W3 zero-padded from 150 to 256 input channels
#   wd1a (128, 32) bf16: decoder Linear(h_size+1,32) weight rows for r
#   dec  (32, 8)   f32 : cols [Wd1b, bd1, Wd2[:,0], Wd2[:,1],
#                              bd2[0]*ones, bd2[1]*ones, 0, 0]
# ----------------------------------------------------------------------------
def _cnp_kernel(yo_ref, xo_ref, xt_ref, enc_ref, w2_ref, w3_ref, wd1a_ref,
                dec_ref, mu_ref, ls_ref):
    f32 = jnp.float32

    def leaky(v):
        return jnp.where(v >= 0, v, _SLOPE * v)

    def bn(v, gamma, beta):
        # PyTorch BatchNorm1d training-mode forward: batch stats, biased var.
        m = jnp.mean(v, axis=0, keepdims=True)
        c = v - m
        var = jnp.mean(c * c, axis=0, keepdims=True)
        return c * lax.rsqrt(var + _EPS) * gamma + beta

    B, N = yo_ref.shape
    T = xt_ref.shape[1]
    BN = B * N
    C2 = w2_ref.shape[1]            # padded width of the 150-channel layer
    H = w3_ref.shape[1]             # h_size

    # ---------------- encoder ----------------
    # BatchNorm1d(2) over all B*N context points (column 0 = y, column 1 = x).
    y = yo_ref[...]
    x = xo_ref[...]
    my = jnp.mean(y, keepdims=True)
    cy = y - my
    vy = jnp.mean(cy * cy, keepdims=True)
    zy = cy * lax.rsqrt(vy + _EPS)                          # (B, N)
    mx = jnp.mean(x, keepdims=True)
    cx = x - mx
    vx = jnp.mean(cx * cx, keepdims=True)
    zx = cx * lax.rsqrt(vx + _EPS)                          # (B, N)

    # Linear(2, 512) with BN0 affine folded in, as one small MXU pass.
    # LHS columns: [zy, zx, 1, 0*5]; only leading-dim-collapsing reshape used.
    z8 = jnp.concatenate(
        [zy[:, :, None], zx[:, :, None],
         jnp.ones((B, N, 1), f32), jnp.zeros((B, N, 5), f32)],
        axis=-1).reshape(BN, 8)                             # (BN, 8)
    E = enc_ref[...]                                        # (9, 512) f32
    h = jnp.dot(z8, E[0:8, :], preferred_element_type=f32)  # (BN, 512)
    h = bn(leaky(h), E[3:4, :], E[4:5, :])

    # Linear(512, 150->256 padded), bf16 MXU operands, f32 accumulate.
    h = jnp.dot(h.astype(jnp.bfloat16), w2_ref[...],
                preferred_element_type=f32) + E[5:6, 0:C2]  # (BN, 256)
    h = bn(leaky(h), E[6:7, 0:C2], E[7:8, 0:C2])            # padded chans -> 0

    # Linear(150->256 padded, 128), bf16 MXU.
    rn = jnp.dot(h.astype(jnp.bfloat16), w3_ref[...],
                 preferred_element_type=f32) + E[8:9, 0:H]  # (BN, 128)

    # Per-sequence mean pooling: leading-dim split + sublane reduce.
    r = jnp.mean(rn.reshape(B, N, H), axis=1)               # (B, 128)

    # ---------------- decoder (B, 32, T) layout ----------------
    D = dec_ref[...]                                        # (32, 8) f32
    h1 = jnp.dot(r.astype(jnp.bfloat16), wd1a_ref[...],
                 preferred_element_type=f32)                # (B, 32), no bias
    wd1b = D[:, 0:1][None, :, :]                            # (1, 32, 1)
    bd1 = D[:, 1:2][None, :, :]
    wmu = D[:, 2:3][None, :, :]
    wls = D[:, 3:4][None, :, :]
    # channels on sublanes, targets on lanes -> sublane reduce, lane-dense out.
    Hd = leaky(h1[:, :, None] + xt_ref[...][:, None, :] * wd1b + bd1)  # (B,32,T)
    mu_ref[...] = jnp.sum(Hd * wmu, axis=1) + D[0:1, 4:5]
    ls_ref[...] = jnp.sum(Hd * wls, axis=1) + D[0:1, 5:6]


# ----------------------------------------------------------------------------
# Parameter packing (done once, outside the hot path).
# ----------------------------------------------------------------------------
def pack_params(p):
    f32, bf16 = jnp.float32, jnp.bfloat16
    W1 = jnp.asarray(p["W1"], f32)                          # (2, 512)
    H1 = W1.shape[1]
    C2 = p["W2"].shape[1]                                   # 150
    H = p["W3"].shape[1]                                    # 128
    C2p = ((C2 + 127) // 128) * 128                         # 256 (aligned)

    # Fold BN0's gamma/beta into the first Linear (algebraically exact).
    w1y = p["g0"][0, 0] * W1[0]
    w1x = p["g0"][0, 1] * W1[1]
    b1e = p["b1"][0] + p["be0"][0, 0] * W1[0] + p["be0"][0, 1] * W1[1]

    def row(v):
        v = jnp.asarray(v, f32).reshape(-1)
        return jnp.pad(v, (0, H1 - v.shape[0]))             # zero-pad to 512

    enc = jnp.stack([
        row(w1y), row(w1x), row(b1e),                       # 0..2  layer-1
        row(p["g1"][0]), row(p["be1"][0]),                  # 3..4  BN1 affine
        row(p["b2"][0]), row(p["g2"][0]), row(p["be2"][0]),  # 5..7 layer-2 (pad=0)
        row(p["b3"][0]),                                    # 8     layer-3 bias
    ], axis=0).astype(f32)                                  # (9, 512)

    w2 = jnp.zeros((p["W2"].shape[0], C2p), f32).at[:, :C2].set(
        jnp.asarray(p["W2"], f32)).astype(bf16)             # (512, 256)
    w3 = jnp.zeros((C2p, H), f32).at[:C2, :].set(
        jnp.asarray(p["W3"], f32)).astype(bf16)             # (256, 128)
    wd1a = jnp.asarray(p["Wd1a"], bf16)                     # (128, 32)

    n32 = p["Wd1a"].shape[1]
    z32 = jnp.zeros((n32,), f32)
    dec = jnp.stack([
        p["Wd1b"][0], p["bd1"][0], p["Wd2"][:, 0], p["Wd2"][:, 1],
        jnp.full((n32,), p["bd2"][0, 0]), jnp.full((n32,), p["bd2"][0, 1]),
        z32, z32,
    ], axis=1).astype(f32)                                  # (32, 8)

    return dict(enc=enc, w2=w2, w3=w3, wd1a=wd1a, dec=dec)


# ----------------------------------------------------------------------------
# Wrapper: one jit == one pallas_call (raw inputs, no wrapper-side XLA ops).
# ----------------------------------------------------------------------------
@jax.jit
def cnp_forward(xobs, yobs, xt, packed):
    B, N = yobs.shape
    _, T = xt.shape
    dt = jnp.float32

    mu, logsigma = pl.pallas_call(
        _cnp_kernel,
        out_shape=(jax.ShapeDtypeStruct((B, T), dt),
                   jax.ShapeDtypeStruct((B, T), dt)),
        in_specs=[pl.BlockSpec(memory_space=pltpu.MemorySpace.VMEM)] * 8,
        out_specs=(pl.BlockSpec(memory_space=pltpu.MemorySpace.VMEM),
                   pl.BlockSpec(memory_space=pltpu.MemorySpace.VMEM)),
    )(yobs, xobs, xt, packed["enc"], packed["w2"], packed["w3"],
      packed["wd1a"], packed["dec"])
    return mu, logsigma


# ----------------------------------------------------------------------------
# Pure-JAX reference (mirrors the PyTorch forward exactly) for verification.
# ----------------------------------------------------------------------------
def cnp_reference(xobs, yobs, xt, params, eps=_EPS, slope=_SLOPE):
    B, N = yobs.shape
    _, T = xt.shape
    p = params

    def bn(x, g, b):
        m = jnp.mean(x, axis=0, keepdims=True)
        v = jnp.mean((x - m) ** 2, axis=0, keepdims=True)
        return (x - m) / jnp.sqrt(v + eps) * g + b

    def leaky(x):
        return jnp.where(x >= 0, x, slope * x)

    xf = jnp.concatenate([yobs.reshape(-1, 1), xobs.reshape(-1, 1)], axis=1)
    xf = bn(xf, p["g0"], p["be0"])
    h = bn(leaky(xf @ p["W1"] + p["b1"]), p["g1"], p["be1"])
    h = bn(leaky(h @ p["W2"] + p["b2"]), p["g2"], p["be2"])
    rn = h @ p["W3"] + p["b3"]
    r = rn.reshape(B, N, -1).mean(axis=1)

    Wd1 = jnp.concatenate([p["Wd1a"], p["Wd1b"]], axis=0)
    mu, ls = [], []
    for ii in range(T):
        inp = jnp.concatenate([r, xt[:, ii:ii + 1]], axis=1)
        h1 = leaky(inp @ Wd1 + p["bd1"])
        phi = h1 @ p["Wd2"] + p["bd2"]
        mu.append(phi[:, 0:1])
        ls.append(phi[:, 1:2])
    return jnp.concatenate(mu, axis=1), jnp.concatenate(ls, axis=1)


# ----------------------------------------------------------------------------
# Deterministic parameter init (PyTorch-style uniform fan-in init).
# ----------------------------------------------------------------------------
def init_params(key, h_size=128):
    def linear(k, fan_in, fan_out):
        k1, k2 = jax.random.split(k)
        bound = 1.0 / math.sqrt(fan_in)
        W = jax.random.uniform(k1, (fan_in, fan_out), jnp.float32, -bound, bound)
        b = jax.random.uniform(k2, (1, fan_out), jnp.float32, -bound, bound)
        return W, b

    keys = jax.random.split(key, 5)
    W1, b1 = linear(keys[0], 2, 512)
    W2, b2 = linear(keys[1], 512, 150)
    W3, b3 = linear(keys[2], 150, h_size)
    Wd1, bd1 = linear(keys[3], h_size + 1, 32)
    Wd2, bd2 = linear(keys[4], 32, 2)

    return dict(
        g0=jnp.ones((1, 2)), be0=jnp.zeros((1, 2)),
        W1=W1, b1=b1, g1=jnp.ones((1, 512)), be1=jnp.zeros((1, 512)),
        W2=W2, b2=b2, g2=jnp.ones((1, 150)), be2=jnp.zeros((1, 150)),
        W3=W3, b3=b3,
        Wd1a=Wd1[:h_size], Wd1b=Wd1[h_size:h_size + 1], bd1=bd1,
        Wd2=Wd2, bd2=bd2,
    )


if __name__ == "__main__":
    key = jax.random.PRNGKey(0)
    kp, kx, ky, kt = jax.random.split(key, 4)

    B, N, T = 2, 8, 8  # batch, context points per sample, target points
    params = init_params(kp)
    packed = pack_params(params)   # one-time packing, off the hot path

    xobs = jax.random.uniform(kx, (B, N), jnp.float32)   # context x positions
    yobs = jax.random.normal(ky, (B, N), jnp.float32)    # context y values
    xt = jax.random.uniform(kt, (B, T), jnp.float32)     # target x positions

    mu, logsigma = cnp_forward(xobs, yobs, xt, packed)
    jax.block_until_ready((mu, logsigma))

    mu_ref, ls_ref = cnp_reference(xobs, yobs, xt, params)
    assert mu.shape == (B, T) and logsigma.shape == (B, T)
    assert jnp.allclose(mu, mu_ref, rtol=1e-2, atol=1e-2)
    assert jnp.allclose(logsigma, ls_ref, rtol=1e-2, atol=1e-2)

    print("KERNEL_OK")
</pallas_src>

<mosaic_0001>
module attributes {stable_mosaic.version = 11 : i64} {
  func.func @_cnp_kernel(%arg0: memref<2x8xf32, #tpu.memory_space<vmem>>, %arg1: memref<2x8xf32, #tpu.memory_space<vmem>>, %arg2: memref<2x8xf32, #tpu.memory_space<vmem>>, %arg3: memref<9x512xf32, #tpu.memory_space<vmem>>, %arg4: memref<512x256xbf16, #tpu.memory_space<vmem>>, %arg5: memref<256x128xbf16, #tpu.memory_space<vmem>>, %arg6: memref<128x32xbf16, #tpu.memory_space<vmem>>, %arg7: memref<32x8xf32, #tpu.memory_space<vmem>>, %arg8: memref<2x8xf32, #tpu.memory_space<vmem>>, %arg9: memref<2x8xf32, #tpu.memory_space<vmem>>) attributes {dimension_semantics = [], scalar_prefetch = 0 : i64, scratch_operands = 0 : i64, tpu.core_type = #tpu.core_type<tc>} {
    %c0 = arith.constant 0 : index
    %c0_0 = arith.constant 0 : index
    %0 = vector.load %arg0[%c0, %c0_0] : memref<2x8xf32, #tpu.memory_space<vmem>>, vector<2x8xf32>
    %c0_1 = arith.constant 0 : index
    %c0_2 = arith.constant 0 : index
    %1 = vector.load %arg1[%c0_1, %c0_2] : memref<2x8xf32, #tpu.memory_space<vmem>>, vector<2x8xf32>
    %2 = vector.shape_cast %0 : vector<2x8xf32> to vector<1x2x8xf32>
    %cst = arith.constant dense<0.000000e+00> : vector<1xf32>
    %3 = vector.multi_reduction <add>, %2, %cst [1, 2] : vector<1x2x8xf32> to vector<1xf32>
    %4 = vector.shape_cast %3 : vector<1xf32> to vector<1x1x1xf32>
    %5 = vector.extract %4[0, 0, 0] : f32 from vector<1x1x1xf32>
    %6 = vector.broadcast %5 : f32 to vector<1x1xf32>
    %cst_3 = arith.constant 1.600000e+01 : f32
    %7 = vector.broadcast %cst_3 : f32 to vector<1x1xf32>
    %8 = arith.divf %6, %7 : vector<1x1xf32>
    %9 = vector.broadcast %8 : vector<1x1xf32> to vector<2x8xf32>
    %10 = arith.subf %0, %9 : vector<2x8xf32>
    %11 = arith.mulf %10, %10 : vector<2x8xf32>
    %12 = vector.shape_cast %11 : vector<2x8xf32> to vector<1x2x8xf32>
    %cst_4 = arith.constant dense<0.000000e+00> : vector<1xf32>
    %13 = vector.multi_reduction <add>, %12, %cst_4 [1, 2] : vector<1x2x8xf32> to vector<1xf32>
    %14 = vector.shape_cast %13 : vector<1xf32> to vector<1x1x1xf32>
    %15 = vector.extract %14[0, 0, 0] : f32 from vector<1x1x1xf32>
    %16 = vector.broadcast %15 : f32 to vector<1x1xf32>
    %cst_5 = arith.constant 1.600000e+01 : f32
    %17 = vector.broadcast %cst_5 : f32 to vector<1x1xf32>
    %18 = arith.divf %16, %17 : vector<1x1xf32>
    %cst_6 = arith.constant 9.99999974E-6 : f32
    %19 = vector.broadcast %cst_6 : f32 to vector<1x1xf32>
    %20 = arith.addf %18, %19 : vector<1x1xf32>
    %21 = math.rsqrt %20 : vector<1x1xf32>
    %22 = vector.broadcast %21 : vector<1x1xf32> to vector<2x8xf32>
    %23 = arith.mulf %10, %22 : vector<2x8xf32>
    %24 = vector.shape_cast %1 : vector<2x8xf32> to vector<1x2x8xf32>
    %cst_7 = arith.constant dense<0.000000e+00> : vector<1xf32>
    %25 = vector.multi_reduction <add>, %24, %cst_7 [1, 2] : vector<1x2x8xf32> to vector<1xf32>
    %26 = vector.shape_cast %25 : vector<1xf32> to vector<1x1x1xf32>
    %27 = vector.extract %26[0, 0, 0] : f32 from vector<1x1x1xf32>
    %28 = vector.broadcast %27 : f32 to vector<1x1xf32>
    %cst_8 = arith.constant 1.600000e+01 : f32
    %29 = vector.broadcast %cst_8 : f32 to vector<1x1xf32>
    %30 = arith.divf %28, %29 : vector<1x1xf32>
    %31 = vector.broadcast %30 : vector<1x1xf32> to vector<2x8xf32>
    %32 = arith.subf %1, %31 : vector<2x8xf32>
    %33 = arith.mulf %32, %32 : vector<2x8xf32>
    %34 = vector.shape_cast %33 : vector<2x8xf32> to vector<1x2x8xf32>
    %cst_9 = arith.constant dense<0.000000e+00> : vector<1xf32>
    %35 = vector.multi_reduction <add>, %34, %cst_9 [1, 2] : vector<1x2x8xf32> to vector<1xf32>
    %36 = vector.shape_cast %35 : vector<1xf32> to vector<1x1x1xf32>
    %37 = vector.extract %36[0, 0, 0] : f32 from vector<1x1x1xf32>
    %38 = vector.broadcast %37 : f32 to vector<1x1xf32>
    %cst_10 = arith.constant 1.600000e+01 : f32
    %39 = vector.broadcast %cst_10 : f32 to vector<1x1xf32>
    %40 = arith.divf %38, %39 : vector<1x1xf32>
    %cst_11 = arith.constant 9.99999974E-6 : f32
    %41 = vector.broadcast %cst_11 : f32 to vector<1x1xf32>
    %42 = arith.addf %40, %41 : vector<1x1xf32>
    %43 = math.rsqrt %42 : vector<1x1xf32>
    %44 = vector.broadcast %43 : vector<1x1xf32> to vector<2x8xf32>
    %45 = arith.mulf %32, %44 : vector<2x8xf32>
    %46 = vector.shape_cast %23 : vector<2x8xf32> to vector<2x8x1xf32>
    %47 = vector.shape_cast %45 : vector<2x8xf32> to vector<2x8x1xf32>
    %cst_12 = arith.constant 1.000000e+00 : f32
    %48 = vector.broadcast %cst_12 : f32 to vector<2x8x1xf32>
    %cst_13 = arith.constant 0.000000e+00 : f32
    %49 = vector.broadcast %cst_13 : f32 to vector<2x8x5xf32>
    %50 = tpu.concatenate %46, %47, %48, %49 in 2 : vector<2x8x1xf32>, vector<2x8x1xf32>, vector<2x8x1xf32>, vector<2x8x5xf32> -> vector<2x8x8xf32>
    %51 = vector.shape_cast %50 : vector<2x8x8xf32> to vector<16x8xf32>
    %c0_14 = arith.constant 0 : index
    %c0_15 = arith.constant 0 : index
    %52 = vector.load %arg3[%c0_14, %c0_15] : memref<9x512xf32, #tpu.memory_space<vmem>>, vector<9x512xf32>
    %53 = vector.extract_strided_slice %52 {offsets = [0, 0], sizes = [8, 512], strides = [1, 1]} : vector<9x512xf32> to vector<8x512xf32>
    %cst_16 = arith.constant dense<0.000000e+00> : vector<16x512xf32>
    %54 = tpu.matmul %51, %53, %cst_16 {dimension_numbers = #tpu.dot_dimension_numbers<[1], [0], [0], [1], [0, 0, 1, 1], [], []>} : vector<16x8xf32>, vector<8x512xf32>, vector<16x512xf32> -> vector<16x512xf32>
    %cst_17 = arith.constant 0.000000e+00 : f32
    %55 = vector.broadcast %cst_17 : f32 to vector<16x512xf32>
    %56 = arith.cmpf oge, %54, %55 : vector<16x512xf32>
    %cst_18 = arith.constant 0.00999999977 : f32
    %57 = vector.broadcast %cst_18 : f32 to vector<16x512xf32>
    %58 = arith.mulf %57, %54 : vector<16x512xf32>
    %59 = arith.select %56, %54, %58 : vector<16x512xi1>, vector<16x512xf32>
    %60 = vector.extract_strided_slice %52 {offsets = [3, 0], sizes = [1, 512], strides = [1, 1]} : vector<9x512xf32> to vector<1x512xf32>
    %61 = vector.extract_strided_slice %52 {offsets = [4, 0], sizes = [1, 512], strides = [1, 1]} : vector<9x512xf32> to vector<1x512xf32>
    %cst_19 = arith.constant dense<0.000000e+00> : vector<512xf32>
    %62 = vector.multi_reduction <add>, %59, %cst_19 [0] : vector<16x512xf32> to vector<512xf32>
    %63 = vector.shape_cast %62 : vector<512xf32> to vector<1x512xf32>
    %cst_20 = arith.constant 1.600000e+01 : f32
    %64 = vector.broadcast %cst_20 : f32 to vector<1x512xf32>
    %65 = arith.divf %63, %64 : vector<1x512xf32>
    %66 = vector.broadcast %65 : vector<1x512xf32> to vector<16x512xf32>
    %67 = arith.subf %59, %66 : vector<16x512xf32>
    %68 = arith.mulf %67, %67 : vector<16x512xf32>
    %cst_21 = arith.constant dense<0.000000e+00> : vector<512xf32>
    %69 = vector.multi_reduction <add>, %68, %cst_21 [0] : vector<16x512xf32> to vector<512xf32>
    %70 = vector.shape_cast %69 : vector<512xf32> to vector<1x512xf32>
    %cst_22 = arith.constant 1.600000e+01 : f32
    %71 = vector.broadcast %cst_22 : f32 to vector<1x512xf32>
    %72 = arith.divf %70, %71 : vector<1x512xf32>
    %cst_23 = arith.constant 9.99999974E-6 : f32
    %73 = vector.broadcast %cst_23 : f32 to vector<1x512xf32>
    %74 = arith.addf %72, %73 : vector<1x512xf32>
    %75 = math.rsqrt %74 : vector<1x512xf32>
    %76 = vector.broadcast %75 : vector<1x512xf32> to vector<16x512xf32>
    %77 = arith.mulf %67, %76 : vector<16x512xf32>
    %78 = vector.broadcast %60 : vector<1x512xf32> to vector<16x512xf32>
    %79 = arith.mulf %77, %78 : vector<16x512xf32>
    %80 = vector.broadcast %61 : vector<1x512xf32> to vector<16x512xf32>
    %81 = arith.addf %79, %80 : vector<16x512xf32>
    %82 = arith.truncf %81 : vector<16x512xf32> to vector<16x512xbf16>
    %c0_24 = arith.constant 0 : index
    %c0_25 = arith.constant 0 : index
    %83 = vector.load %arg4[%c0_24, %c0_25] : memref<512x256xbf16, #tpu.memory_space<vmem>>, vector<512x256xbf16>
    %cst_26 = arith.constant dense<0.000000e+00> : vector<16x256xf32>
    %84 = tpu.matmul %82, %83, %cst_26 {dimension_numbers = #tpu.dot_dimension_numbers<[1], [0], [0], [1], [0, 0, 1, 1], [], []>} : vector<16x512xbf16>, vector<512x256xbf16>, vector<16x256xf32> -> vector<16x256xf32>
    %85 = vector.extract_strided_slice %52 {offsets = [5, 0], sizes = [1, 256], strides = [1, 1]} : vector<9x512xf32> to vector<1x256xf32>
    %86 = vector.broadcast %85 : vector<1x256xf32> to vector<16x256xf32>
    %87 = arith.addf %84, %86 : vector<16x256xf32>
    %cst_27 = arith.constant 0.000000e+00 : f32
    %88 = vector.broadcast %cst_27 : f32 to vector<16x256xf32>
    %89 = arith.cmpf oge, %87, %88 : vector<16x256xf32>
    %cst_28 = arith.constant 0.00999999977 : f32
    %90 = vector.broadcast %cst_28 : f32 to vector<16x256xf32>
    %91 = arith.mulf %90, %87 : vector<16x256xf32>
    %92 = arith.select %89, %87, %91 : vector<16x256xi1>, vector<16x256xf32>
    %93 = vector.extract_strided_slice %52 {offsets = [6, 0], sizes = [1, 256], strides = [1, 1]} : vector<9x512xf32> to vector<1x256xf32>
    %94 = vector.extract_strided_slice %52 {offsets = [7, 0], sizes = [1, 256], strides = [1, 1]} : vector<9x512xf32> to vector<1x256xf32>
    %cst_29 = arith.constant dense<0.000000e+00> : vector<256xf32>
    %95 = vector.multi_reduction <add>, %92, %cst_29 [0] : vector<16x256xf32> to vector<256xf32>
    %96 = vector.shape_cast %95 : vector<256xf32> to vector<1x256xf32>
    %cst_30 = arith.constant 1.600000e+01 : f32
    %97 = vector.broadcast %cst_30 : f32 to vector<1x256xf32>
    %98 = arith.divf %96, %97 : vector<1x256xf32>
    %99 = vector.broadcast %98 : vector<1x256xf32> to vector<16x256xf32>
    %100 = arith.subf %92, %99 : vector<16x256xf32>
    %101 = arith.mulf %100, %100 : vector<16x256xf32>
    %cst_31 = arith.constant dense<0.000000e+00> : vector<256xf32>
    %102 = vector.multi_reduction <add>, %101, %cst_31 [0] : vector<16x256xf32> to vector<256xf32>
    %103 = vector.shape_cast %102 : vector<256xf32> to vector<1x256xf32>
    %cst_32 = arith.constant 1.600000e+01 : f32
    %104 = vector.broadcast %cst_32 : f32 to vector<1x256xf32>
    %105 = arith.divf %103, %104 : vector<1x256xf32>
    %cst_33 = arith.constant 9.99999974E-6 : f32
    %106 = vector.broadcast %cst_33 : f32 to vector<1x256xf32>
    %107 = arith.addf %105, %106 : vector<1x256xf32>
    %108 = math.rsqrt %107 : vector<1x256xf32>
    %109 = vector.broadcast %108 : vector<1x256xf32> to vector<16x256xf32>
    %110 = arith.mulf %100, %109 : vector<16x256xf32>
    %111 = vector.broadcast %93 : vector<1x256xf32> to vector<16x256xf32>
    %112 = arith.mulf %110, %111 : vector<16x256xf32>
    %113 = vector.broadcast %94 : vector<1x256xf32> to vector<16x256xf32>
    %114 = arith.addf %112, %113 : vector<16x256xf32>
    %115 = arith.truncf %114 : vector<16x256xf32> to vector<16x256xbf16>
    %c0_34 = arith.constant 0 : index
    %c0_35 = arith.constant 0 : index
    %116 = vector.load %arg5[%c0_34, %c0_35] : memref<256x128xbf16, #tpu.memory_space<vmem>>, vector<256x128xbf16>
    %cst_36 = arith.constant dense<0.000000e+00> : vector<16x128xf32>
    %117 = tpu.matmul %115, %116, %cst_36 {dimension_numbers = #tpu.dot_dimension_numbers<[1], [0], [0], [1], [0, 0, 1, 1], [], []>} : vector<16x256xbf16>, vector<256x128xbf16>, vector<16x128xf32> -> vector<16x128xf32>
    %118 = vector.extract_strided_slice %52 {offsets = [8, 0], sizes = [1, 128], strides = [1, 1]} : vector<9x512xf32> to vector<1x128xf32>
    %119 = vector.broadcast %118 : vector<1x128xf32> to vector<16x128xf32>
    %120 = arith.addf %117, %119 : vector<16x128xf32>
    %121 = vector.shape_cast %120 : vector<16x128xf32> to vector<2x8x128xf32>
    %cst_37 = arith.constant dense<0.000000e+00> : vector<2x128xf32>
    %122 = vector.multi_reduction <add>, %121, %cst_37 [1] : vector<2x8x128xf32> to vector<2x128xf32>
    %cst_38 = arith.constant 8.000000e+00 : f32
    %123 = vector.broadcast %cst_38 : f32 to vector<2x128xf32>
    %124 = arith.divf %122, %123 : vector<2x128xf32>
    %c0_39 = arith.constant 0 : index
    %c0_40 = arith.constant 0 : index
    %125 = vector.load %arg7[%c0_39, %c0_40] : memref<32x8xf32, #tpu.memory_space<vmem>>, vector<32x8xf32>
    %126 = arith.truncf %124 : vector<2x128xf32> to vector<2x128xbf16>
    %c0_41 = arith.constant 0 : index
    %c0_42 = arith.constant 0 : index
    %127 = vector.load %arg6[%c0_41, %c0_42] : memref<128x32xbf16, #tpu.memory_space<vmem>>, vector<128x32xbf16>
    %cst_43 = arith.constant dense<0.000000e+00> : vector<2x32xf32>
    %128 = tpu.matmul %126, %127, %cst_43 {dimension_numbers = #tpu.dot_dimension_numbers<[1], [0], [0], [1], [0, 0, 1, 1], [], []>} : vector<2x128xbf16>, vector<128x32xbf16>, vector<2x32xf32> -> vector<2x32xf32>
    %129 = vector.extract_strided_slice %125 {offsets = [0, 0], sizes = [32, 1], strides = [1, 1]} : vector<32x8xf32> to vector<32x1xf32>
    %130 = vector.shape_cast %129 : vector<32x1xf32> to vector<1x32x1xf32>
    %131 = vector.extract_strided_slice %125 {offsets = [0, 1], sizes = [32, 1], strides = [1, 1]} : vector<32x8xf32> to vector<32x1xf32>
    %132 = vector.shape_cast %131 : vector<32x1xf32> to vector<1x32x1xf32>
    %133 = vector.extract_strided_slice %125 {offsets = [0, 2], sizes = [32, 1], strides = [1, 1]} : vector<32x8xf32> to vector<32x1xf32>
    %134 = vector.shape_cast %133 : vector<32x1xf32> to vector<1x32x1xf32>
    %135 = vector.extract_strided_slice %125 {offsets = [0, 3], sizes = [32, 1], strides = [1, 1]} : vector<32x8xf32> to vector<32x1xf32>
    %136 = vector.shape_cast %135 : vector<32x1xf32> to vector<1x32x1xf32>
    %137 = vector.shape_cast %128 : vector<2x32xf32> to vector<2x32x1xf32>
    %c0_44 = arith.constant 0 : index
    %c0_45 = arith.constant 0 : index
    %138 = vector.load %arg2[%c0_44, %c0_45] : memref<2x8xf32, #tpu.memory_space<vmem>>, vector<2x8xf32>
    %139 = vector.shape_cast %138 : vector<2x8xf32> to vector<2x1x8xf32>
    %140 = vector.broadcast %139 : vector<2x1x8xf32> to vector<2x32x8xf32>
    %141 = vector.broadcast %130 : vector<1x32x1xf32> to vector<2x32x8xf32>
    %142 = arith.mulf %140, %141 : vector<2x32x8xf32>
    %143 = vector.broadcast %137 : vector<2x32x1xf32> to vector<2x32x8xf32>
    %144 = arith.addf %143, %142 : vector<2x32x8xf32>
    %145 = vector.broadcast %132 : vector<1x32x1xf32> to vector<2x32x8xf32>
    %146 = arith.addf %144, %145 : vector<2x32x8xf32>
    %cst_46 = arith.constant 0.000000e+00 : f32
    %147 = vector.broadcast %cst_46 : f32 to vector<2x32x8xf32>
    %148 = arith.cmpf oge, %146, %147 : vector<2x32x8xf32>
    %cst_47 = arith.constant 0.00999999977 : f32
    %149 = vector.broadcast %cst_47 : f32 to vector<2x32x8xf32>
    %150 = arith.mulf %149, %146 : vector<2x32x8xf32>
    %151 = arith.select %148, %146, %150 : vector<2x32x8xi1>, vector<2x32x8xf32>
    %152 = vector.broadcast %134 : vector<1x32x1xf32> to vector<2x32x8xf32>
    %153 = arith.mulf %151, %152 : vector<2x32x8xf32>
    %cst_48 = arith.constant dense<0.000000e+00> : vector<2x8xf32>
    %154 = vector.multi_reduction <add>, %153, %cst_48 [1] : vector<2x32x8xf32> to vector<2x8xf32>
    %155 = vector.extract_strided_slice %125 {offsets = [0, 4], sizes = [1, 1], strides = [1, 1]} : vector<32x8xf32> to vector<1x1xf32>
    %156 = vector.broadcast %155 : vector<1x1xf32> to vector<2x8xf32>
    %157 = arith.addf %154, %156 : vector<2x8xf32>
    %c0_49 = arith.constant 0 : index
    %c0_50 = arith.constant 0 : index
    %158 = vector.load %arg8[%c0_49, %c0_50] : memref<2x8xf32, #tpu.memory_space<vmem>>, vector<2x8xf32>
    tpu.vector_store %arg8[%c0_49, %c0_50], %157 {strides = array<i32>} : memref<2x8xf32, #tpu.memory_space<vmem>>, vector<2x8xf32>,
    %159 = vector.broadcast %136 : vector<1x32x1xf32> to vector<2x32x8xf32>
    %160 = arith.mulf %151, %159 : vector<2x32x8xf32>
    %cst_51 = arith.constant dense<0.000000e+00> : vector<2x8xf32>
    %161 = vector.multi_reduction <add>, %160, %cst_51 [1] : vector<2x32x8xf32> to vector<2x8xf32>
    %162 = vector.extract_strided_slice %125 {offsets = [0, 5], sizes = [1, 1], strides = [1, 1]} : vector<32x8xf32> to vector<1x1xf32>
    %163 = vector.broadcast %162 : vector<1x1xf32> to vector<2x8xf32>
    %164 = arith.addf %161, %163 : vector<2x8xf32>
    %c0_52 = arith.constant 0 : index
    %c0_53 = arith.constant 0 : index
    %165 = vector.load %arg9[%c0_52, %c0_53] : memref<2x8xf32, #tpu.memory_space<vmem>>, vector<2x8xf32>
    tpu.vector_store %arg9[%c0_52, %c0_53], %164 {strides = array<i32>} : memref<2x8xf32, #tpu.memory_space<vmem>>, vector<2x8xf32>,
    return
  }
}

</mosaic_0001>

<bundles_post_ra>
// kernel: cnp_forward.1
= control target key start
LH: loop header
LB: loop body
LE: loop exit
PB: predicated region body
PF: predicated region fallthrough
CT: control target
= control target key end

     0   :  { %15 = vsyncpa [#allocation3], 0  ;;  %s2560_s0 = inlined_call_operand.vmem [shape: f32[2,8], index: 0, kind: input, shape index: {}]   ;;  %s2561_s1 = inlined_call_operand.hbm [shape: f32[2,8], index: 1, kind: input, shape index: {}]   ;;  %s2562_s2 = inlined_call_operand.hbm [shape: f32[2,8], index: 2, kind: input, shape index: {}]   ;;  %s2563_s3 = inlined_call_operand.hbm [shape: f32[9,512], index: 3, kind: input, shape index: {}]   ;;  %s2564_s4 = inlined_call_operand.hbm [shape: bf16[512,256], index: 4, kind: input, shape index: {}]   ;;  %s2565_s5 = inlined_call_operand.vmem [shape: bf16[256,128], index: 5, kind: input, shape index: {}]   ;;  %s2566_s6 = inlined_call_operand.vmem [shape: bf16[128,32], index: 6, kind: input, shape index: {}]   ;;  %s2567_s7 = inlined_call_operand.vmem [shape: f32[32,8], index: 7, kind: input, shape index: {}]   ;;  %s2568_s8 = inlined_call_operand.hbm [shape: f32[2,8], index: 8, kind: output, shape index: {0}]   ;;  %s2569_s9 = inlined_call_operand.hbm [shape: f32[2,8], index: 9, kind: output, shape index: {1}]  }
   0x1   :  { %16 = vsyncpa [#allocation6], 0 }
   0x2   :  { %17 = vsyncpa [#allocation9], 0 }
   0x3   :  { %18 = vsyncpa [#allocation4], 0 }
   0x4   :  { %19 = vsyncpa [#allocation12], 0  ;;  %s2174_s30 = smov [#allocation5]   ;;  %s2175_s11 = smov [#allocation2]  }
   0x5   :  { %s38_s10 = sshll.u32 %s2174_s30, 4  ;;  %s28_s12 = sshll.u32 %s2175_s11, 4  ;;  %s39_s10 = int_to_ptr.vmem [resolvable:$true] %s38_s10  ;;  %s29_s12 = int_to_ptr.vmem [resolvable:$true] %s28_s12 }
   0x6   :  { %s2032_s15 = scalar_lea.hbm %s2562_s2, 32 }
   0x7   :  { %p2033_p0 = scmp.ne.s32.totalorder %s2562_s2, %s2032_s15  ;;  %p2036_p1 = scmp.lt.u32.totalorder %s2032_s15, %s2562_s2 }
   0x9   :  { %p2038_p2 = pnand %p2036_p1, %p2033_p0 }
   0xb   :  { %2041 = shalt.err (!%p2038_p2)
}
   0xc   :  { %s2042_s20 = scalar_lea.vmem %s39_s10, 32  ;;  %p2047_p4 = scmp.lt.s32.totalorder %s39_s10, %s39_s10 }
   0xd   :  { %p2043_p3 = scmp.ne.s32.totalorder %s39_s10, %s2042_s20  ;;  %p2048_p5 = scmp.lt.s32.totalorder %s2042_s20, %s2042_s20 }
   0xf   :  { %p2049_p6 = por %p2048_p5, %p2047_p4 }
  0x11   :  { %p2050_p7 = pnand %p2049_p6, %p2043_p3 }
  0x13   :  { %2053 = shalt.err (!%p2050_p7)
}
  0x14   :  { %41 = dma.hbm_to_vmem [thread:$0]  %s2562_s2, 32, %s39_s10, [#allocation6]  }
  0x15   :  { %s2054_s25 = scalar_lea.hbm %s2561_s1, 32 }
  0x16   :  { %p2055_p8 = scmp.ne.s32.totalorder %s2561_s1, %s2054_s25  ;;  %p2058_p9 = scmp.lt.u32.totalorder %s2054_s25, %s2561_s1 }
  0x18   :  { %p2060_p10 = pnand %p2058_p9, %p2055_p8 }
  0x1a   :  { %2063 = shalt.err (!%p2060_p10)
}
  0x1b   :  { %s2064_s30 = scalar_lea.vmem %s29_s12, 32  ;;  %p2069_p12 = scmp.lt.s32.totalorder %s29_s12, %s29_s12 }
  0x1c   :  { %p2065_p11 = scmp.ne.s32.totalorder %s29_s12, %s2064_s30  ;;  %p2070_p13 = scmp.lt.s32.totalorder %s2064_s30, %s2064_s30 }
  0x1e   :  { %p2071_p0 = por %p2070_p13, %p2069_p12 }
  0x20   :  { %p2072_p1 = pnand %p2071_p0, %p2065_p11 }
  0x22   :  { %2075 = shalt.err (!%p2072_p1)
}
  0x23   :  { %31 = dma.hbm_to_vmem [thread:$0]  %s2561_s1, 32, %s29_s12, [#allocation3]  }
  0x24   :  { %s2176_s11 = smov [#allocation7]   ;;  %s2076_s16 = scalar_lea.hbm %s2563_s3, 1024 }
  0x25   :  { %s47_s13 = sshll.u32 %s2176_s11, 4  ;;  %p2077_p2 = scmp.ne.s32.totalorder %s2563_s3, %s2076_s16  ;;  %s48_s13 = int_to_ptr.vmem [resolvable:$true] %s47_s13 }
  0x26   :  { %p2080_p3 = scmp.lt.u32.totalorder %s2076_s16, %s2563_s3 }
  0x28   :  { %p2082_p4 = pnand %p2080_p3, %p2077_p2 }
  0x2a   :  { %2085 = shalt.err (!%p2082_p4)
}
  0x2b   :  { %s2086_s21 = scalar_lea.vmem %s48_s13, 1024  ;;  %p2091_p6 = scmp.lt.s32.totalorder %s48_s13, %s48_s13 }
  0x2c   :  { %p2087_p5 = scmp.ne.s32.totalorder %s48_s13, %s2086_s21  ;;  %p2092_p7 = scmp.lt.s32.totalorder %s2086_s21, %s2086_s21 }
  0x2e   :  { %p2093_p8 = por %p2092_p7, %p2091_p6 }
  0x30   :  { %p2094_p9 = pnand %p2093_p8, %p2087_p5 }
  0x32   :  { %2097 = shalt.err (!%p2094_p9)
}
  0x33   :  { %s2177_s1 = smov 512   ;;  %s2178_s12 = smov 32  }
  0x34   :  { %53 = dma.hbm_to_vmem [thread:$0]  %s2563_s3, 1024, %s48_s13, [#allocation6], %s2177_s1, %s2177_s1, %s2178_s12  }
  0x35   :  { %s2179_s24 = smov [#allocation8]   ;;  %s2098_s28 = scalar_lea.hbm %s2564_s4, 8192 }
  0x36   :  { %s59_s25 = sshll.u32 %s2179_s24, 4  ;;  %p2099_p10 = scmp.ne.s32.totalorder %s2564_s4, %s2098_s28  ;;  %s60_s25 = int_to_ptr.vmem [resolvable:$true] %s59_s25 }
  0x37   :  { %p2102_p11 = scmp.lt.u32.totalorder %s2098_s28, %s2564_s4 }
  0x39   :  { %p2104_p12 = pnand %p2102_p11, %p2099_p10 }
  0x3b   :  { %2107 = shalt.err (!%p2104_p12)
}
  0x3c   :  { %s2108_s11 = scalar_lea.vmem %s60_s25, 8192  ;;  %p2113_p0 = scmp.lt.s32.totalorder %s60_s25, %s60_s25 }
  0x3d   :  { %p2109_p13 = scmp.ne.s32.totalorder %s60_s25, %s2108_s11  ;;  %p2114_p1 = scmp.lt.s32.totalorder %s2108_s11, %s2108_s11 }
  0x3f   :  { %p2115_p2 = por %p2114_p1, %p2113_p0 }
  0x41   :  { %p2116_p3 = pnand %p2115_p2, %p2109_p13 }
  0x43   :  { %2119 = shalt.err (!%p2116_p3)
}
  0x44   :  { %s2180_s3 = smov 128   ;;  %s2181_s13 = smov 8  }
  0x45   :  { %65 = dma.hbm_to_vmem [thread:$0]  %s2564_s4, 8192, %s60_s25, [#allocation9], %s2180_s3, %s2180_s3, %s2181_s13  }
  0x46   :  { %2164 = dma.done.wait [#allocation3], 32  }
  0x47   :  { %2165 = vsyncadd [#allocation3], 4294967264 }
  0x48   :  { %2166 = dma.done.wait [#allocation6], 1056  }
  0x49   :  { %2167 = vsyncadd [#allocation6], 4294966240 }
  0x4a   :  { %2168 = dma.done.wait [#allocation9], 8192  }
  0x4b   :  { %2169 = vsyncadd [#allocation9], 4294959104  ;;  %vm87_vm0 = vcmask 58368   ;;  %v85_v0 = vld [vmem:[%s2560_s0] sm:$0x3]  ;;  %v147_v37 = vlaneseq  ;;  %v2308_v56 = vld [vmem:[#allocation7 + $0x8] sm:$0xff] }
  0x4c   :  { %v88_v1 = vsel %vm87_vm0, %v85_v0, 0.0  ;;  %v86_v2 = vld [vmem:[#allocation2] sm:$0x3]  ;;  %196 = vmatprep.subr.mxu1 %v2308_v56  ;;  %v2311_v57 = vld [vmem:[#allocation7] sm:$0xff]  ;;  %v2182_v58 = vmov 0.0   ;;  %vm175_vm1 = vcmask 7168  }
  0x4d   :  { %89 = vadd.xlane.f32.xlu0 %v88_v1  ;;  %v118_v3 = vsel %vm87_vm0, %v86_v2, 0.0  ;;  %v2298_v39 = vshrl.u32 %v147_v37, 7  ;;  %197 = vmatpush1.msra.mxu1 %v2311_v57  ;;  %v2315_v59 = vld [vmem:[#allocation7 + $0x18] sm:$0xff]  ;;  %vm178_vm2 = vcmask 15360   ;;  %vm181_vm3 = vcmask 23552   ;;  %s2191_s23 = smov [#allocation11]  }
  0x4e   :  { %119 = vadd.xlane.f32.xlu1 %v118_v3  ;;  %260 = vmatprep.mubr.f32.mxu1 %v2182_v58  ;;  %vm189_vm4 = vcmask 64512   ;;  %v1935_v37 = vld [vmem:[#allocation8 + $0xd4] ss:$8 sps:$4 sm:$0xff]  }
  0x4f   :  { %v2301_v40 = vsub.s32 0, %v2298_v39  ;;  %v2305_v44 = vsub.s32 1, %v2298_v39  ;;  %273 = vmatprep.subr.mxu1 %v2315_v59 }
  0xda   :  { %v90_v4 = vpop.xlane.xlu0 %89 }
  0xdb   :  { %v91_v5 = vrot.slane %v90_v4, 4  ;;  %v120_v16 = vpop.xlane.xlu1 %119 }
  0xdc   :  { %v121_v17 = vrot.slane %v120_v16, 4 }
  0xdd   :  { %v92_v6 = vadd.f32 %v91_v5, %v90_v4  ;;  %v2320_v5 = vld [vmem:[#allocation7 + $0x10] sm:$0xff] }
  0xde   :  { %v122_v18 = vadd.f32 %v121_v17, %v120_v16  ;;  %v1904_v16 = vld [vmem:[#allocation8 + $0x20] ss:$8 sps:$4 sm:$0xff]   ;;  %v1905_v17 = vld [vmem:[#allocation8 + $0x34] ss:$8 sps:$4 sm:$0xff]  }
  0xdf   :  { %v93_v7 = vrot.slane %v92_v6, 2 }
  0xe0   :  { %v123_v19 = vrot.slane %v122_v18, 2 }
  0xe1   :  { %v94_v8 = vadd.f32 %v93_v7, %v92_v6 }
  0xe2   :  { %v124_v23 = vadd.f32 %v123_v19, %v122_v18  ;;  %v1907_v18 = vld [vmem:[#allocation8 + $0x30] ss:$8 sps:$4 sm:$0xff]   ;;  %v1908_v19 = vld [vmem:[#allocation8 + $0x44] ss:$8 sps:$4 sm:$0xff]  }
  0xe3   :  { %v95_v9 = vrot.slane %v94_v8, 1 }
  0xe4   :  { %v125_v26 = vrot.slane %v124_v23, 1 }
  0xe5   :  { %v96_v10 = vadd.f32 %v95_v9, %v94_v8 }
  0xe6   :  { %v126_v29 = vadd.f32 %v125_v26, %v124_v23  ;;  %v1914_v23 = vld [vmem:[#allocation8 + $0x64] ss:$8 sps:$4 sm:$0xff]   ;;  %v1919_v26 = vld [vmem:[#allocation8 + $0x70] ss:$8 sps:$4 sm:$0xff]  }
  0xe7   :  { %1856 = vpush %v96_v10 }
 0x118   :  { %s1857_s4 = spop %1856 }
 0x119   :  { %v98_v11 = vstv %s1857_s4 }
 0x11a   :  { %v100_v12 = vmul.f32 0.0625, %v98_v11  ;;  %v1896_v11 = vld [vmem:[#allocation8 + $0x4] ss:$8 sps:$4 sm:$0xff]  }
 0x11b   :  { %914 = vmatprep.subr.bf16.mxu0 %v1896_v11 }
 0x11c   :  { %v101_v13 = vsub.f32 %v85_v0, %v100_v12  ;;  %v1898_v12 = vld [vmem:[#allocation8] ss:$8 sps:$4 sm:$0xff]  }
 0x11d   :  { %915 = vmatpush1.bf16.msra.mxu0 %v1898_v12 }
 0x11e   :  { %v102_v14 = vmul.f32 %v101_v13, %v101_v13 }
 0x120   :  { %v103_v15 = vsel %vm87_vm0, %v102_v14, 0.0  ;;  %v1901_v14 = vld [vmem:[#allocation8 + $0x10] ss:$8 sps:$4 sm:$0xff]  }
 0x121   :  { %104 = vadd.xlane.f32.xlu0 %v103_v15  ;;  %v1902_v15 = vld [vmem:[#allocation8 + $0x24] ss:$8 sps:$4 sm:$0xff]  }
 0x1ae   :  { %v105_v20 = vpop.xlane.xlu0 %104 }
 0x1af   :  { %v106_v21 = vrot.slane %v105_v20, 4 }
 0x1b1   :  { %v107_v22 = vadd.f32 %v106_v21, %v105_v20  ;;  %v1910_v20 = vld [vmem:[#allocation8 + $0x40] ss:$8 sps:$4 sm:$0xff]   ;;  %v1911_v21 = vld [vmem:[#allocation8 + $0x54] ss:$8 sps:$4 sm:$0xff]  }
 0x1b3   :  { %v108_v24 = vrot.slane %v107_v22, 2 }
 0x1b5   :  { %v109_v25 = vadd.f32 %v108_v24, %v107_v22  ;;  %v1913_v22 = vld [vmem:[#allocation8 + $0x50] ss:$8 sps:$4 sm:$0xff]   ;;  %v1916_v24 = vld [vmem:[#allocation8 + $0x60] ss:$8 sps:$4 sm:$0xff]  }
 0x1b7   :  { %v110_v27 = vrot.slane %v109_v25, 1 }
 0x1b9   :  { %v111_v28 = vadd.f32 %v110_v27, %v109_v25  ;;  %v1917_v25 = vld [vmem:[#allocation8 + $0x74] ss:$8 sps:$4 sm:$0xff]   ;;  %v1920_v27 = vld [vmem:[#allocation8 + $0x84] ss:$8 sps:$4 sm:$0xff]  }
 0x1bb   :  { %1858 = vpush %v111_v28  ;;  %v1922_v28 = vld [vmem:[#allocation8 + $0x80] ss:$8 sps:$4 sm:$0xff]  }
 0x1bc   :  { %1860 = vpush %v126_v29  ;;  %v1923_v29 = vld [vmem:[#allocation8 + $0x94] ss:$8 sps:$4 sm:$0xff]  }
 0x1ec   :  { %s1859_s0 = spop %1858 }
 0x1ed   :  { %v113_v30 = vstv %s1859_s0  ;;  %s1861_s18 = spop %1860  ;;  %s2184_s0 = smov 123  }
 0x1ee   :  { %v114_v31 = vmul.f32 0.0625, %v113_v30  ;;  %v128_v32 = vstv %s1861_s18  ;;  %v1925_v30 = vld [vmem:[#allocation8 + $0x90] ss:$8 sps:$4 sm:$0xff]   ;;  %s2185_s18 = smov 124  }
 0x1ef   :  { %v129_v33 = vmul.f32 0.0625, %v128_v32  ;;  %v1928_v32 = vld [vmem:[#allocation8 + $0xa0] ss:$8 sps:$4 sm:$0xff]  }
 0x1f0   :  { %v115_v34 = vadd.f32 1e-05, %v114_v31  ;;  %v1926_v31 = vld [vmem:[#allocation8 + $0xa4] ss:$8 sps:$4 sm:$0xff]  }
 0x1f1   :  { %v130_v35 = vsub.f32 %v86_v2, %v129_v33  ;;  %v1929_v33 = vld [vmem:[#allocation8 + $0xb4] ss:$8 sps:$4 sm:$0xff]  }
 0x1f2   :  { %2016 = vrsqrt.f32 %v115_v34  ;;  %v1931_v34 = vld [vmem:[#allocation8 + $0xb0] ss:$8 sps:$4 sm:$0xff]  }
 0x1f3   :  { %v131_v36 = vmul.f32 %v130_v35, %v130_v35 }
 0x1f5   :  { %v132_v38 = vsel %vm87_vm0, %v131_v36, 0.0  ;;  %v1934_v36 = vld [vmem:[#allocation8 + $0xc0] ss:$8 sps:$4 sm:$0xff]  }
 0x1f6   :  { %133 = vadd.xlane.f32.xlu1 %v132_v38  ;;  %v1937_v38 = vld [vmem:[#allocation8 + $0xd0] ss:$8 sps:$4 sm:$0xff]  }
 0x1fc   :  { %v2017_v41 = vpop.eup %2016 }
 0x1fd   :  { %v117_v42 = vmul.f32 %v2017_v41, %v101_v13  ;;  %v1899_v13 = vld [vmem:[#allocation8 + $0x14] ss:$8 sps:$4 sm:$0xff]   ;;  %v1938_v41 = vld [vmem:[#allocation8 + $0xe4] ss:$8 sps:$4 sm:$0xff]  }
 0x1fe   :  { %916 = vmatprep.subr.bf16.mxu0 %v1899_v13 }
 0x1ff   :  { %v150_v43 = vrot.slane %v117_v42, %v2301_v40  ;;  %v157_v45 = vrot.slane %v117_v42, %v2305_v44  ;;  %917 = vmatpush1.bf16.msra.mxu0 %v1901_v14  ;;  %v1940_v42 = vld [vmem:[#allocation8 + $0xe0] ss:$8 sps:$4 sm:$0xff]  }
 0x200   :  { %918 = vmatprep.subr.bf16.mxu0 %v1902_v15 }
 0x201   :  { %152 = vbcast.lane.b32.xlu0 %v150_v43, 256  ;;  %v1941_v43 = vld [vmem:[#allocation8 + $0xf4] ss:$8 sps:$4 sm:$0xff]  }
 0x203   :  { %919 = vmatpush1.bf16.msra.mxu0 %v1904_v16 }
 0x204   :  { %920 = vmatprep.subr.bf16.mxu0 %v1905_v17 }
 0x207   :  { %159 = vbcast.lane.b32.xlu1 %v157_v45, 256  ;;  %921 = vmatpush1.bf16.msra.mxu0 %v1907_v18  ;;  %v1943_v45 = vld [vmem:[#allocation8 + $0xf0] ss:$8 sps:$4 sm:$0xff]  }
 0x208   :  { %922 = vmatprep.subr.bf16.mxu0 %v1908_v19 }
 0x20b   :  { %923 = vmatpush1.bf16.msra.mxu0 %v1910_v20 }
 0x20c   :  { %924 = vmatprep.subr.bf16.mxu0 %v1911_v21 }
 0x20f   :  { %925 = vmatpush1.bf16.msra.mxu0 %v1913_v22 }
 0x210   :  { %926 = vmatprep.subr.bf16.mxu0 %v1914_v23 }
 0x213   :  { %927 = vmatpush1.bf16.msra.mxu0 %v1916_v24 }
 0x214   :  { %928 = vmatprep.subr.bf16.mxu0 %v1917_v25 }
 0x217   :  { %929 = vmatpush1.bf16.msra.mxu0 %v1919_v26 }
 0x218   :  { %930 = vmatprep.subr.bf16.mxu0 %v1920_v27 }
 0x21b   :  { %931 = vmatpush1.bf16.msra.mxu0 %v1922_v28 }
 0x21c   :  { %932 = vmatprep.subr.bf16.mxu0 %v1923_v29 }
 0x21f   :  { %933 = vmatpush1.bf16.msra.mxu0 %v1925_v30 }
 0x220   :  { %934 = vmatprep.subr.bf16.mxu0 %v1926_v31 }
 0x223   :  { %935 = vmatpush1.bf16.msra.mxu0 %v1928_v32 }
 0x224   :  { %936 = vmatprep.subr.bf16.mxu0 %v1929_v33 }
 0x227   :  { %937 = vmatpush1.bf16.msra.mxu0 %v1931_v34 }
 0x273   :  { %v153_v1 = vpop.permute.xlu0 %152 }
 0x283   :  { %v134_v46 = vpop.xlane.xlu1 %133 }
 0x284   :  { %v135_v47 = vrot.slane %v134_v46, 4 }
 0x286   :  { %v136_v48 = vadd.f32 %v135_v47, %v134_v46  ;;  %v1946_v46 = vld [vmem:[#allocation8 + $0x104] ss:$8 sps:$4 sm:$0xff]  }
 0x287   :  { %v160_v0 = vpop.permute.xlu1 %159 }
 0x288   :  { %v137_v49 = vrot.slane %v136_v48, 2 }
 0x28a   :  { %v138_v50 = vadd.f32 %v137_v49, %v136_v48 }
 0x28c   :  { %v139_v51 = vrot.slane %v138_v50, 1 }
 0x28e   :  { %v140_v52 = vadd.f32 %v139_v51, %v138_v50 }
 0x290   :  { %1862 = vpush %v140_v52 }
 0x2c1   :  { %s1863_s19 = spop %1862 }
 0x2c2   :  { %v142_v53 = vstv %s1863_s19 }
 0x2c3   :  { %v143_v54 = vmul.f32 0.0625, %v142_v53 }
 0x2c5   :  { %v144_v55 = vadd.f32 1e-05, %v143_v54 }
 0x2c7   :  { %2018 = vrsqrt.f32 %v144_v55 }
 0x2d1   :  { %v2019_v60 = vpop.eup %2018 }
 0x2d2   :  { %v146_v61 = vmul.f32 %v2019_v60, %v130_v35  ;;  %v1932_v35 = vld [vmem:[#allocation8 + $0xc4] ss:$8 sps:$4 sm:$0xff]  }
 0x2d3   :  { %938 = vmatprep.subr.bf16.mxu0 %v1932_v35 }
 0x2d4   :  { %v164_v62 = vrot.slane %v146_v61, %v2301_v40  ;;  %v171_v63 = vrot.slane %v146_v61, %v2305_v44  ;;  %939 = vmatpush1.bf16.msra.mxu0 %v1934_v36 }
 0x2d5   :  { %940 = vmatprep.subr.bf16.mxu0 %v1935_v37 }
 0x2d6   :  { %166 = vbcast.lane.b32.xlu1 %v164_v62, 256 }
 0x2d8   :  { %941 = vmatpush1.bf16.msra.mxu0 %v1937_v38 }
 0x2d9   :  { %942 = vmatprep.subr.bf16.mxu0 %v1938_v41 }
 0x2da   :  { %173 = vbcast.lane.b32.xlu1 %v171_v63, 256 }
 0x2dc   :  { %943 = vmatpush1.bf16.msra.mxu0 %v1940_v42 }
 0x2dd   :  { %944 = vmatprep.subr.bf16.mxu0 %v1941_v43 }
 0x2e0   :  { %945 = vmatpush1.bf16.msra.mxu0 %v1943_v45 }
 0x2e1   :  { %957 = vmatprep.subr.bf16.mxu0 %v1946_v46 }
 0x348   :  { %v167_v2 = vpop.permute.xlu1 %166 }
 0x349   :  { %v176_v3 = vsel %vm175_vm1, %v153_v1, %v167_v2 }
 0x34a   :  { %v179_v4 = vsel %vm178_vm2, %v176_v3, 1.0 }
 0x34b   :  { %v182_v6 = vsel %vm181_vm3, %v179_v4, 0.0 }
 0x34c   :  { %v174_v7 = vpop.permute.xlu1 %173  ;;  %1703 = vmatmul.mubr.msk.f32.vlgmr.msra.gmra.mrb[0].mxu1 %vm189_vm4, %v182_v6 }
 0x34d   :  { %v177_v8 = vsel %vm175_vm1, %v160_v0, %v174_v7  ;;  %266 = vmatprep.mubr.f32.mxu1 %v2182_v58  ;;  %274 = vmatpush1.msra.mxu1 %v2320_v5 }
 0x34e   :  { %v180_v9 = vsel %vm178_vm2, %v177_v8, 1.0  ;;  %vm2183_vm2 = vmmov 0  }
 0x34f   :  { %v183_v10 = vsel %vm181_vm3, %v180_v9, 0.0  ;;  %vm1300_vm3 = vcmask 1041409  }
 0x350   :  { %1704 = vmatmul.mubr.msk.f32.gmra.mrb[2].mxu1 %vm189_vm4, %v183_v10 }
 0x351   :  { %337 = vmatprep.mubr.f32.mxu1 %v2182_v58 }
 0x354   :  { %1705 = vmatmul.mubr.msk.f32.vlgmr.msra.gmra.mrb[4].mxu1 %vm189_vm4, %v182_v6 }
 0x355   :  { %343 = vmatprep.mubr.f32.mxu1 %v2182_v58 }
 0x358   :  { %1706 = vmatmul.mubr.msk.f32.gmra.mrb[6].mxu1 %vm189_vm4, %v183_v10 }
 0x41f   :  { %v262_v47 = vpop.f32.mrb[0].mxu1 }
 0x420   :  { %v264_v48 = vpop.f32.mrb[1].mxu1  ;;  %v358_v49 = vmul.f32 0.01, %v262_v47  ;;  %vm350_vm5 = vcmp.ge.f32.partialorder %v262_v47, 0.0 }
 0x421   :  { %v359_v50 = vmul.f32 0.01, %v264_v48  ;;  %vm351_vm6 = vcmp.ge.f32.partialorder %v264_v48, 0.0 }
 0x422   :  { %v366_v55 = vsel %vm350_vm5, %v262_v47, %v358_v49 }
 0x423   :  { %v268_v51 = vpop.f32.mrb[2].mxu1  ;;  %v367_v61 = vsel %vm351_vm6, %v264_v48, %v359_v50 }
 0x424   :  { %vm354_vm7 = vcmp.ge.f32.partialorder %v268_v51, 0.0  ;;  %v362_v52 = vmul.f32 0.01, %v268_v51  ;;  %v270_v53 = vpop.f32.mrb[3].mxu1 }
 0x425   :  { %vm355_vm8 = vcmp.ge.f32.partialorder %v270_v53, 0.0  ;;  %v363_v54 = vmul.f32 0.01, %v270_v53 }
 0x426   :  { %v370_v60 = vsel %vm354_vm7, %v268_v51, %v362_v52 }
 0x427   :  { %v374_v62 = vadd.f32 %v370_v60, %v366_v55  ;;  %v371_v63 = vsel %vm355_vm8, %v270_v53, %v363_v54  ;;  %v339_v0 = vpop.f32.mrb[4].mxu1 }
 0x428   :  { %v381_v1 = vadd.f32 %v371_v63, %v367_v61  ;;  %v341_v2 = vpop.f32.mrb[5].mxu1  ;;  %v360_v6 = vmul.f32 0.01, %v339_v0  ;;  %vm352_vm9 = vcmp.ge.f32.partialorder %v339_v0, 0.0 }
 0x429   :  { %v375_v3 = vrot.slane %v374_v62, 4  ;;  %v361_v8 = vmul.f32 0.01, %v341_v2  ;;  %vm353_vm10 = vcmp.ge.f32.partialorder %v341_v2, 0.0 }
 0x42a   :  { %v382_v4 = vrot.slane %v381_v1, 4  ;;  %v368_v16 = vsel %vm352_vm9, %v339_v0, %v360_v6 }
 0x42b   :  { %v376_v7 = vadd.f32 %v375_v3, %v374_v62  ;;  %v345_v9 = vpop.f32.mrb[6].mxu1  ;;  %v369_v19 = vsel %vm353_vm10, %v341_v2, %v361_v8 }
 0x42c   :  { %v383_v10 = vadd.f32 %v382_v4, %v381_v1  ;;  %vm356_vm11 = vcmp.ge.f32.partialorder %v345_v9, 0.0  ;;  %v364_v11 = vmul.f32 0.01, %v345_v9  ;;  %v347_v12 = vpop.f32.mrb[7].mxu1 }
 0x42d   :  { %v377_v13 = vrot.slane %v376_v7, 2  ;;  %vm357_vm12 = vcmp.ge.f32.partialorder %v347_v12, 0.0  ;;  %v365_v14 = vmul.f32 0.01, %v347_v12 }
 0x42e   :  { %v384_v15 = vrot.slane %v383_v10, 2  ;;  %v372_v17 = vsel %vm356_vm11, %v345_v9, %v364_v11 }
 0x42f   :  { %v378_v18 = vadd.f32 %v377_v13, %v376_v7  ;;  %v388_v20 = vadd.f32 %v372_v17, %v368_v16  ;;  %v373_v21 = vsel %vm357_vm12, %v347_v12, %v365_v14 }
 0x430   :  { %v385_v22 = vadd.f32 %v384_v15, %v383_v10  ;;  %v395_v23 = vadd.f32 %v373_v21, %v369_v19 }
 0x431   :  { %v379_v24 = vrot.slane %v378_v18, 1  ;;  %v389_v25 = vrot.slane %v388_v20, 4 }
 0x432   :  { %v386_v26 = vrot.slane %v385_v22, 1  ;;  %v396_v27 = vrot.slane %v395_v23, 4 }
 0x433   :  { %v380_v28 = vadd.f32 %v379_v24, %v378_v18  ;;  %v390_v29 = vadd.f32 %v389_v25, %v388_v20 }
 0x434   :  { %v387_v30 = vadd.f32 %v386_v26, %v385_v22  ;;  %v397_v31 = vadd.f32 %v396_v27, %v395_v23 }
 0x435   :  { %v402_v32 = vmul.f32 0.0625, %v380_v28  ;;  %v391_v33 = vrot.slane %v390_v29, 2 }
 0x436   :  { %v403_v34 = vmul.f32 0.0625, %v387_v30  ;;  %v398_v35 = vrot.slane %v397_v31, 2 }
 0x437   :  { %v2330_v36 = vsub.f32 %v366_v55, %v402_v32  ;;  %v2332_v37 = vsub.f32 %v370_v60, %v402_v32  ;;  %v392_v38 = vadd.f32 %v391_v33, %v390_v29 }
 0x438   :  { %v2334_v41 = vsub.f32 %v371_v63, %v403_v34  ;;  %v399_v42 = vadd.f32 %v398_v35, %v397_v31  ;;  %v2336_v43 = vsub.f32 %v367_v61, %v403_v34 }
 0x439   :  { %v414_v45 = vmul.f32 %v2330_v36, %v2330_v36  ;;  %v418_v46 = vmul.f32 %v2332_v37, %v2332_v37  ;;  %v393_v47 = vrot.slane %v392_v38, 1 }
 0x43a   :  { %v419_v48 = vmul.f32 %v2334_v41, %v2334_v41  ;;  %v400_v49 = vrot.slane %v399_v42, 1  ;;  %v415_v50 = vmul.f32 %v2336_v43, %v2336_v43 }
 0x43b   :  { %v422_v51 = vadd.f32 %v418_v46, %v414_v45  ;;  %v394_v52 = vadd.f32 %v393_v47, %v392_v38  ;;  %v496_v47 = vsub.s32 4, %v2298_v39 }
 0x43c   :  { %v401_v53 = vadd.f32 %v400_v49, %v399_v42  ;;  %v429_v54 = vadd.f32 %v419_v48, %v415_v50  ;;  %v472_v42 = vsub.s32 3, %v2298_v39 }
 0x43d   :  { %v423_v55 = vrot.slane %v422_v51, 4  ;;  %v404_v60 = vmul.f32 0.0625, %v394_v52 }
 0x43e   :  { %v405_v61 = vmul.f32 0.0625, %v401_v53  ;;  %v430_v62 = vrot.slane %v429_v54, 4  ;;  %v473_v49 = vrot.slane %v2311_v57, %v472_v42 }
 0x43f   :  { %v424_v63 = vadd.f32 %v423_v55, %v422_v51  ;;  %v2346_v0 = vsub.f32 %v368_v16, %v404_v60  ;;  %v2348_v1 = vsub.f32 %v372_v17, %v404_v60  ;;  %v477_v51 = vrot.slane %v2308_v56, %v472_v42 }
 0x440   :  { %v2350_v2 = vsub.f32 %v369_v19, %v405_v61  ;;  %v2352_v3 = vsub.f32 %v373_v21, %v405_v61  ;;  %v431_v4 = vadd.f32 %v430_v62, %v429_v54  ;;  %v497_v55 = vrot.slane %v2311_v57, %v496_v47 }
 0x441   :  { %v425_v6 = vrot.slane %v424_v63, 2  ;;  %v416_v7 = vmul.f32 %v2346_v0, %v2346_v0  ;;  %v420_v8 = vmul.f32 %v2348_v1, %v2348_v1  ;;  %v501_v62 = vrot.slane %v2308_v56, %v496_v47 }
 0x442   :  { %v417_v9 = vmul.f32 %v2350_v2, %v2350_v2  ;;  %v421_v10 = vmul.f32 %v2352_v3, %v2352_v3  ;;  %v432_v11 = vrot.slane %v431_v4, 2 }
 0x443   :  { %v426_v12 = vadd.f32 %v425_v6, %v424_v63  ;;  %v436_v13 = vadd.f32 %v420_v8, %v416_v7 }
 0x444   :  { %v443_v14 = vadd.f32 %v421_v10, %v417_v9  ;;  %v433_v15 = vadd.f32 %v432_v11, %v431_v4 }
 0x445   :  { %v427_v16 = vrot.slane %v426_v12, 1  ;;  %v437_v17 = vrot.slane %v436_v13, 4 }
 0x446   :  { %v444_v18 = vrot.slane %v443_v14, 4  ;;  %v434_v19 = vrot.slane %v433_v15, 1 }
 0x447   :  { %v428_v20 = vadd.f32 %v427_v16, %v426_v12  ;;  %v438_v21 = vadd.f32 %v437_v17, %v436_v13  ;;  %v485_v13 = vrot.slane %v2315_v59, %v472_v42 }
 0x448   :  { %v445_v22 = vadd.f32 %v444_v18, %v443_v14  ;;  %v435_v23 = vadd.f32 %v434_v19, %v433_v15  ;;  %v1949_v18 = vld [vmem:[#allocation8 + $0x114] ss:$8 sps:$4 sm:$0xff]   ;;  %v509_v19 = vrot.slane %v2315_v59, %v496_v47 }
 0x449   :  { %v450_v24 = vmul.f32 0.0625, %v428_v20  ;;  %v439_v25 = vrot.slane %v438_v21, 2 }
 0x44a   :  { %v446_v26 = vrot.slane %v445_v22, 2  ;;  %v451_v27 = vmul.f32 0.0625, %v435_v23 }
 0x44b   :  { %v454_v28 = vadd.f32 1e-05, %v450_v24  ;;  %v440_v29 = vadd.f32 %v439_v25, %v438_v21  ;;  %v1947_v24 = vld [vmem:[#allocation8 + $0x110] ss:$8 sps:$4 sm:$0xff]  }
 0x44c   :  { %v447_v30 = vadd.f32 %v446_v26, %v445_v22  ;;  %v455_v31 = vadd.f32 1e-05, %v451_v27 }
 0x44d   :  { %2020 = vrsqrt.f32 %v454_v28  ;;  %v441_v32 = vrot.slane %v440_v29, 1 }
 0x44e   :  { %v448_v33 = vrot.slane %v447_v30, 1  ;;  %2022 = vrsqrt.f32 %v455_v31  ;;  %v1958_v31 = vld [vmem:[#allocation8 + $0x144] ss:$8 sps:$4 sm:$0xff]  }
 0x44f   :  { %v442_v34 = vadd.f32 %v441_v32, %v440_v29  ;;  %v1956_v32 = vld [vmem:[#allocation8 + $0x140] ss:$8 sps:$4 sm:$0xff]  }
 0x450   :  { %v449_v35 = vadd.f32 %v448_v33, %v447_v30  ;;  %v1953_v30 = vld [vmem:[#allocation8 + $0x130] ss:$8 sps:$4 sm:$0xff]   ;;  %v1961_v33 = vld [vmem:[#allocation8 + $0x154] ss:$8 sps:$4 sm:$0xff]  }
 0x451   :  { %v452_v38 = vmul.f32 0.0625, %v442_v34  ;;  %v1959_v34 = vld [vmem:[#allocation8 + $0x150] ss:$8 sps:$4 sm:$0xff]  }
 0x452   :  { %v453_v45 = vmul.f32 0.0625, %v449_v35  ;;  %v1964_v35 = vld [vmem:[#allocation8 + $0x164] ss:$8 sps:$4 sm:$0xff]  }
 0x453   :  { %v456_v46 = vadd.f32 1e-05, %v452_v38  ;;  %v1962_v38 = vld [vmem:[#allocation8 + $0x160] ss:$8 sps:$4 sm:$0xff]  }
 0x454   :  { %v457_v48 = vadd.f32 1e-05, %v453_v45  ;;  %v1965_v45 = vld [vmem:[#allocation8 + $0x170] ss:$8 sps:$4 sm:$0xff]  }
 0x455   :  { %2024 = vrsqrt.f32 %v456_v46  ;;  %v1970_v46 = vld [vmem:[#allocation8 + $0x184] ss:$8 sps:$4 sm:$0xff]  }
 0x456   :  { %2026 = vrsqrt.f32 %v457_v48  ;;  %v1973_v48 = vld [vmem:[#allocation8 + $0x194] ss:$8 sps:$4 sm:$0xff]  }
 0x457   :  { %v2021_v50 = vpop.eup %2020 }
 0x458   :  { %v2023_v52 = vpop.eup %2022  ;;  %v466_v53 = vmul.f32 %v2021_v50, %v2332_v37  ;;  %v462_v54 = vmul.f32 %v2021_v50, %v2330_v36  ;;  %v481_v37 = vrot.slane %v2320_v5, %v472_v42  ;;  %v1967_v42 = vld [vmem:[#allocation8 + $0x174] ss:$8 sps:$4 sm:$0xff]   ;;  %v1976_v50 = vld [vmem:[#allocation8 + $0x1a4] ss:$8 sps:$4 sm:$0xff]  }
 0x459   :  { %v463_v60 = vmul.f32 %v2023_v52, %v2336_v43  ;;  %v467_v61 = vmul.f32 %v2023_v52, %v2334_v41  ;;  %v1944_v43 = vld [vmem:[#allocation8 + $0x100] ss:$8 sps:$4 sm:$0xff]   ;;  %v505_v41 = vrot.slane %v2320_v5, %v496_v47  ;;  %v1952_v5 = vld [vmem:[#allocation8 + $0x124] ss:$8 sps:$4 sm:$0xff]   ;;  %v1979_v52 = vld [vmem:[#allocation8 + $0x1b4] ss:$8 sps:$4 sm:$0xff]  }
 0x45a   :  { %v486_v63 = vmul.f32 %v473_v49, %v462_v54  ;;  %v490_v4 = vmul.f32 %v473_v49, %v466_v53  ;;  %v1968_v47 = vld [vmem:[#allocation8 + $0x180] ss:$8 sps:$4 sm:$0xff]   ;;  %v1971_v49 = vld [vmem:[#allocation8 + $0x190] ss:$8 sps:$4 sm:$0xff]   ;;  %v1982_v54 = vld [vmem:[#allocation8 + $0x1c4] ss:$8 sps:$4 sm:$0xff]  }
 0x45b   :  { %v487_v6 = vmul.f32 %v477_v51, %v463_v60  ;;  %v491_v7 = vmul.f32 %v477_v51, %v467_v61  ;;  %v1974_v51 = vld [vmem:[#allocation8 + $0x1a0] ss:$8 sps:$4 sm:$0xff]   ;;  %v1977_v53 = vld [vmem:[#allocation8 + $0x1b0] ss:$8 sps:$4 sm:$0xff]   ;;  %v1985_v60 = vld [vmem:[#allocation8 + $0x1d4] ss:$8 sps:$4 sm:$0xff]  }
 0x45c   :  { %v510_v8 = vadd.f32 %v497_v55, %v486_v63  ;;  %v514_v9 = vadd.f32 %v497_v55, %v490_v4  ;;  %v1980_v55 = vld [vmem:[#allocation8 + $0x1c0] ss:$8 sps:$4 sm:$0xff]   ;;  %v1983_v61 = vld [vmem:[#allocation8 + $0x1d0] ss:$8 sps:$4 sm:$0xff]   ;;  %v1991_v4 = vld [vmem:[#allocation8 + $0x1f4] ss:$8 sps:$4 sm:$0xff]  }
 0x45d   :  { %v511_v10 = vadd.f32 %v501_v62, %v487_v6  ;;  %v515_v11 = vadd.f32 %v501_v62, %v491_v7  ;;  %v1988_v62 = vld [vmem:[#allocation8 + $0x1e4] ss:$8 sps:$4 sm:$0xff]   ;;  %v1986_v63 = vld [vmem:[#allocation8 + $0x1e0] ss:$8 sps:$4 sm:$0xff]   ;;  %v1989_v6 = vld [vmem:[#allocation8 + $0x1f0] ss:$8 sps:$4 sm:$0xff]  }
 0x45e   :  { %v518_v12 = vpack.c.bf16 %v514_v9, %v510_v8  ;;  %v1992_v7 = vld [vmem:[%s2565_s5 + $0x40] sm:$0xff]   ;;  %v1994_v9 = vld [vmem:[%s2565_s5 + $0x48] sm:$0xff]  }
 0x45f   :  { %v2025_v36 = vpop.eup %2024  ;;  %v519_v14 = vpack.c.bf16 %v515_v11, %v511_v10  ;;  %v1993_v8 = vld [vmem:[%s2565_s5] sm:$0xff]   ;;  %1797 = vmatprep.subr.bf16.mxu1 %v1992_v7  ;;  %v1995_v10 = vld [vmem:[%s2565_s5 + $0x8] sm:$0xff]   ;;  %v1996_v11 = vld [vmem:[%s2565_s5 + $0x50] sm:$0xff]  }
 0x460   :  { %v2027_v15 = vpop.eup %2026  ;;  %v464_v16 = vmul.f32 %v2025_v36, %v2346_v0  ;;  %v468_v17 = vmul.f32 %v2025_v36, %v2348_v1  ;;  %1798 = vmatpush3.bf16.msra.mxu1 %v1993_v8  ;;  %v1999_v36 = vld [vmem:[%s2565_s5 + $0x18] sm:$0xff]  }
 0x461   :  { %v469_v20 = vmul.f32 %v2027_v15, %v2352_v3  ;;  %946 = vmatprep.mubr.bf16.mxu0 %v519_v14  ;;  %v465_v21 = vmul.f32 %v2027_v15, %v2350_v2  ;;  %v1950_v3 = vld [vmem:[#allocation8 + $0x120] ss:$8 sps:$4 sm:$0xff]   ;;  %v1955_v2 = vld [vmem:[#allocation8 + $0x134] ss:$8 sps:$4 sm:$0xff]   ;;  %1799 = vmatprep.subr.bf16.mxu1 %v1994_v9 }
 0x462   :  { %v492_v22 = vmul.f32 %v481_v37, %v468_v17  ;;  %947 = vmatmul.mubr.bf16.vlgmr.msra.gmra.mrb[0].mxu0 %v518_v12  ;;  %v488_v23 = vmul.f32 %v481_v37, %v464_v16  ;;  %v1997_v37 = vld [vmem:[%s2565_s5 + $0x10] sm:$0xff]   ;;  %v1998_v12 = vld [vmem:[%s2565_s5 + $0x58] sm:$0xff]   ;;  %v2001_v14 = vld [vmem:[%s2565_s5 + $0x20] sm:$0xff]  }
 0x463   :  { %958 = vmatpush1.bf16.msra.mxu0 %v1944_v43  ;;  %v489_v25 = vmul.f32 %v485_v13, %v465_v21  ;;  %v493_v26 = vmul.f32 %v485_v13, %v469_v20  ;;  %v2000_v13 = vld [vmem:[%s2565_s5 + $0x60] sm:$0xff]   ;;  %v2002_v43 = vld [vmem:[%s2565_s5 + $0x68] sm:$0xff]   ;;  %v2005_v16 = vld [vmem:[%s2565_s5 + $0x30] sm:$0xff]  }
 0x464   :  { %959 = vmatprep.subr.bf16.mxu0 %v1949_v18  ;;  %v2380_v0 = vadd.f32 %v505_v41, %v488_v23  ;;  %v516_v1 = vadd.f32 %v505_v41, %v492_v22  ;;  %1800 = vmatpush3.bf16.msra.mxu1 %v1995_v10  ;;  %v2003_v15 = vld [vmem:[%s2565_s5 + $0x28] sm:$0xff]   ;;  %v2004_v41 = vld [vmem:[%s2565_s5 + $0x70] sm:$0xff]   ;;  %v2006_v17 = vld [vmem:[%s2565_s5 + $0x78] sm:$0xff]  }
 0x465   :  { %v513_v27 = vadd.f32 %v509_v19, %v489_v25  ;;  %v517_v28 = vadd.f32 %v509_v19, %v493_v26  ;;  %1801 = vmatprep.subr.bf16.mxu1 %v1996_v11  ;;  %v2007_v18 = vld [vmem:[%s2565_s5 + $0x38] sm:$0xff]   ;;  %v588_v19 = vsub.s32 5, %v2298_v39  ;;  %s1688_s5 = sshll.u32 %s2191_s23, 4  ;;  %s1689_s5 = int_to_ptr.vmem [resolvable:$true] %s1688_s5 }
 0x466   :  { %v520_v59 = vpack.c.bf16 %v516_v1, %v2380_v0  ;;  %s2120_s24 = scalar_lea.vmem %s1689_s5, 32  ;;  %p2125_p5 = scmp.lt.s32.totalorder %s1689_s5, %s1689_s5 }
 0x467   :  { %960 = vmatpush1.bf16.msra.mxu0 %v1947_v24  ;;  %v521_v29 = vpack.c.bf16 %v517_v28, %v513_v27  ;;  %v589_v20 = vrot.slane %v2311_v57, %v588_v19  ;;  %v593_v21 = vrot.slane %v2308_v56, %v588_v19  ;;  %p2121_p4 = scmp.ne.s32.totalorder %s1689_s5, %s2120_s24  ;;  %p2126_p6 = scmp.lt.s32.totalorder %s2120_s24, %s2120_s24 }
 0x468   :  { %961 = vmatprep.subr.bf16.mxu0 %v1952_v5  ;;  %1802 = vmatpush3.bf16.msra.mxu1 %v1997_v37 }
 0x469   :  { %989 = vmatprep.mubr.bf16.mxu0 %v521_v29  ;;  %1803 = vmatprep.subr.bf16.mxu1 %v1998_v12  ;;  %p2127_p7 = por %p2126_p6, %p2125_p5 }
 0x46b   :  { %962 = vmatpush1.bf16.msra.mxu0 %v1950_v3  ;;  %p2128_p8 = pnand %p2127_p7, %p2121_p4 }
 0x46c   :  { %963 = vmatprep.subr.bf16.mxu0 %v1955_v2  ;;  %1804 = vmatpush3.bf16.msra.mxu1 %v1999_v36 }
 0x46d   :  { %1805 = vmatprep.subr.bf16.mxu1 %v2000_v13 }
 0x46f   :  { %964 = vmatpush1.bf16.msra.mxu0 %v1953_v30 }
 0x470   :  { %965 = vmatprep.subr.bf16.mxu0 %v1958_v31  ;;  %1806 = vmatpush3.bf16.msra.mxu1 %v2001_v14 }
 0x471   :  { %1807 = vmatprep.subr.bf16.mxu1 %v2002_v43 }
 0x473   :  { %966 = vmatpush1.bf16.msra.mxu0 %v1956_v32 }
 0x474   :  { %967 = vmatprep.subr.bf16.mxu0 %v1961_v33  ;;  %1808 = vmatpush3.bf16.msra.mxu1 %v2003_v15 }
 0x475   :  { %1809 = vmatprep.subr.bf16.mxu1 %v2004_v41 }
 0x477   :  { %968 = vmatpush1.bf16.msra.mxu0 %v1959_v34 }
 0x478   :  { %969 = vmatprep.subr.bf16.mxu0 %v1964_v35  ;;  %1810 = vmatpush3.bf16.msra.mxu1 %v2005_v16 }
 0x479   :  { %1811 = vmatprep.subr.bf16.mxu1 %v2006_v17 }
 0x47b   :  { %970 = vmatpush1.bf16.msra.mxu0 %v1962_v38 }
 0x47c   :  { %971 = vmatprep.subr.bf16.mxu0 %v1967_v42  ;;  %1812 = vmatpush3.bf16.msra.mxu1 %v2007_v18 }
 0x47d   :  { %1828 = vmatprep.subr.bf16.mxu1 %v2182_v58 }
 0x47f   :  { %972 = vmatpush1.bf16.msra.mxu0 %v1965_v45 }
 0x480   :  { %973 = vmatprep.subr.bf16.mxu0 %v1970_v46 }
 0x483   :  { %974 = vmatpush1.bf16.msra.mxu0 %v1968_v47 }
 0x484   :  { %975 = vmatprep.subr.bf16.mxu0 %v1973_v48 }
 0x487   :  { %976 = vmatpush1.bf16.msra.mxu0 %v1971_v49 }
 0x488   :  { %977 = vmatprep.subr.bf16.mxu0 %v1976_v50 }
 0x48b   :  { %978 = vmatpush1.bf16.msra.mxu0 %v1974_v51 }
 0x48c   :  { %979 = vmatprep.subr.bf16.mxu0 %v1979_v52 }
 0x48f   :  { %980 = vmatpush1.bf16.msra.mxu0 %v1977_v53 }
 0x490   :  { %981 = vmatprep.subr.bf16.mxu0 %v1982_v54 }
 0x493   :  { %982 = vmatpush1.bf16.msra.mxu0 %v1980_v55 }
 0x494   :  { %983 = vmatprep.subr.bf16.mxu0 %v1985_v60 }
 0x497   :  { %984 = vmatpush1.bf16.msra.mxu0 %v1983_v61 }
 0x498   :  { %985 = vmatprep.subr.bf16.mxu0 %v1988_v62 }
 0x49b   :  { %986 = vmatpush1.bf16.msra.mxu0 %v1986_v63 }
 0x49c   :  { %987 = vmatprep.subr.bf16.mxu0 %v1991_v4 }
 0x49f   :  { %988 = vmatpush1.bf16.msra.mxu0 %v1989_v6 }
 0x4a2   :  { %990 = vmatmul.mubr.bf16.vlgmr.msra.gmra.mrb[0].mxu0 %v520_v59 }
 0x575   :  { %v991_v22 = vpop.f32.mrb[0].mxu0 }
 0x576   :  { %v1848_v23 = vadd.f32 %v991_v22, %v589_v20  ;;  %v993_v24 = vpop.f32.mrb[1].mxu0  ;;  %v1062_v22 = vsub.s32 6, %v2298_v39 }
 0x577   :  { %v1849_v25 = vadd.f32 %v993_v24, %v593_v21  ;;  %v995_v26 = vpop.f32.mrb[2].mxu0 }
 0x578   :  { %v1004_v5 = vmul.f32 0.01, %v1848_v23  ;;  %v1850_v0 = vadd.f32 %v995_v26, %v589_v20  ;;  %v997_v1 = vpop.f32.mrb[3].mxu0  ;;  %vm1000_vm13 = vcmp.ge.f32.partialorder %v1848_v23, 0.0  ;;  %v1063_v24 = vrot.slane %v2311_v57, %v1062_v22 }
 0x579   :  { %v1005_v27 = vmul.f32 0.01, %v1849_v25  ;;  %v1851_v28 = vadd.f32 %v997_v1, %v593_v21  ;;  %vm1001_vm14 = vcmp.ge.f32.partialorder %v1849_v25, 0.0  ;;  %v1067_v26 = vrot.slane %v2308_v56, %v1062_v22 }
 0x57a   :  { %vm1002_vm15 = vcmp.ge.f32.partialorder %v1850_v0, 0.0  ;;  %v1006_v59 = vmul.f32 0.01, %v1850_v0  ;;  %v1008_v29 = vsel %vm1000_vm13, %v1848_v23, %v1004_v5  ;;  %v1074_v23 = vsub.s32 7, %v2298_v39 }
 0x57b   :  { %vm1003_vm1 = vcmp.ge.f32.partialorder %v1851_v28, 0.0  ;;  %v1007_v3 = vmul.f32 0.01, %v1851_v28  ;;  %v1009_v30 = vsel %vm1001_vm14, %v1849_v25, %v1005_v27 }
 0x57c   :  { %v1010_v2 = vsel %vm1002_vm15, %v1850_v0, %v1006_v59  ;;  %v1075_v27 = vrot.slane %v2311_v57, %v1074_v23  ;;  %v2010_v57 = vld [vmem:[%s2566_s6 + $0x10] sm:$0xff]  }
 0x57d   :  { %v1012_v31 = vadd.f32 %v1010_v2, %v1008_v29  ;;  %v1011_v32 = vsel %vm1003_vm1, %v1851_v28, %v1007_v3  ;;  %v1079_v3 = vrot.slane %v2308_v56, %v1074_v23  ;;  %v2009_v56 = vld [vmem:[%s2566_s6 + $0x8] sm:$0xff]  }
 0x57e   :  { %v1019_v33 = vadd.f32 %v1011_v32, %v1009_v30 }
 0x57f   :  { %v1013_v34 = vrot.slane %v1012_v31, 4 }
 0x580   :  { %v1020_v35 = vrot.slane %v1019_v33, 4 }
 0x581   :  { %v1014_v38 = vadd.f32 %v1013_v34, %v1012_v31 }
 0x582   :  { %v1021_v42 = vadd.f32 %v1020_v35, %v1019_v33 }
 0x583   :  { %v1015_v45 = vrot.slane %v1014_v38, 2 }
 0x584   :  { %v1022_v46 = vrot.slane %v1021_v42, 2 }
 0x585   :  { %v1016_v47 = vadd.f32 %v1015_v45, %v1014_v38  ;;  %v2008_v45 = vld [vmem:[%s2566_s6] sm:$0xff]  }
 0x586   :  { %v1023_v48 = vadd.f32 %v1022_v46, %v1021_v42  ;;  %v2011_v46 = vld [vmem:[%s2566_s6 + $0x18] sm:$0xff]  }
 0x587   :  { %v1017_v49 = vrot.slane %v1016_v47, 1 }
 0x588   :  { %v1024_v50 = vrot.slane %v1023_v48, 1 }
 0x589   :  { %v1018_v51 = vadd.f32 %v1017_v49, %v1016_v47  ;;  %v2012_v47 = vld [vmem:[%s2566_s6 + $0x20] sm:$0xff]   ;;  %v2014_v49 = vld [vmem:[%s2566_s6 + $0x30] sm:$0xff]  }
 0x58a   :  { %v1025_v52 = vadd.f32 %v1024_v50, %v1023_v48  ;;  %v2013_v48 = vld [vmem:[%s2566_s6 + $0x28] sm:$0xff]   ;;  %v2015_v50 = vld [vmem:[%s2566_s6 + $0x38] sm:$0xff]  }
 0x58b   :  { %v1026_v53 = vmul.f32 0.0625, %v1018_v51  ;;  %v1274_v51 = vld [vmem:[%s2567_s7] sm:$0xff] }
 0x58c   :  { %v1027_v54 = vmul.f32 0.0625, %v1025_v52  ;;  %1660 = vrot.lane.b32.xlu1 %v1274_v51, %s2184_s0  ;;  %1598 = vrot.lane.b32.xlu0 %v1274_v51, %s2185_s18  ;;  %v2186_v52 = vmov 0  }
 0x58d   :  { %v1028_v55 = vsub.f32 %v1008_v29, %v1026_v53  ;;  %v1030_v60 = vsub.f32 %v1010_v2, %v1026_v53  ;;  %1888 = vset.pattern.permute.xlu1 %v2186_v52  ;;  %v1275_v53 = vld [vmem:[%s2567_s7 + $0x8] sm:$0xff]  ;;  %1887 = vset.pattern.permute.xlu0 %v2186_v52 }
 0x58e   :  { %v1029_v61 = vsub.f32 %v1009_v30, %v1027_v54  ;;  %v1031_v62 = vsub.f32 %v1011_v32, %v1027_v54  ;;  %v2485_v54 = vld [vmem:[%s2567_s7 + $0x18] sm:$0xff] }
 0x58f   :  { %v1032_v63 = vmul.f32 %v1028_v55, %v1028_v55  ;;  %v1034_v4 = vmul.f32 %v1030_v60, %v1030_v60 }
 0x590   :  { %v1033_v6 = vmul.f32 %v1029_v61, %v1029_v61  ;;  %v1035_v7 = vmul.f32 %v1031_v62, %v1031_v62  ;;  %1471 = vperm.xlu1 %1888, %v1275_v53   ;;  %1466 = vperm.xlu0 %1887, %v1274_v51  }
 0x591   :  { %v1036_v8 = vadd.f32 %v1034_v4, %v1032_v63  ;;  %v1771_v63 = vld [vmem:[#allocation7 + $0x20] ss:$0 sm:$0xff] }
 0x592   :  { %v1043_v9 = vadd.f32 %v1035_v7, %v1033_v6 }
 0x593   :  { %v1037_v10 = vrot.slane %v1036_v8, 4 }
 0x594   :  { %v1044_v11 = vrot.slane %v1043_v9, 4  ;;  %1481 = vperm.xlu0 %1887, %v2485_v54  }
 0x595   :  { %v1038_v37 = vadd.f32 %v1037_v10, %v1036_v8 }
 0x596   :  { %v1045_v12 = vadd.f32 %v1044_v11, %v1043_v9 }
 0x597   :  { %v1039_v36 = vrot.slane %v1038_v37, 2 }
 0x598   :  { %v1046_v13 = vrot.slane %v1045_v12, 2 }
 0x599   :  { %v1040_v14 = vadd.f32 %v1039_v36, %v1038_v37 }
 0x59a   :  { %v1047_v43 = vadd.f32 %v1046_v13, %v1045_v12 }
 0x59b   :  { %v1041_v15 = vrot.slane %v1040_v14, 1 }
 0x59c   :  { %v1048_v41 = vrot.slane %v1047_v43, 1 }
 0x59d   :  { %v1042_v16 = vadd.f32 %v1041_v15, %v1040_v14 }
 0x59e   :  { %v1049_v17 = vadd.f32 %v1048_v41, %v1047_v43 }
 0x59f   :  { %v1050_v18 = vmul.f32 0.0625, %v1042_v16 }
 0x5a0   :  { %v1051_v19 = vmul.f32 0.0625, %v1049_v17 }
 0x5a1   :  { %v1052_v20 = vadd.f32 1e-05, %v1050_v18 }
 0x5a2   :  { %v1053_v21 = vadd.f32 1e-05, %v1051_v19 }
 0x5a3   :  { %2028 = vrsqrt.f32 %v1052_v20 }
 0x5a4   :  { %2030 = vrsqrt.f32 %v1053_v21 }
 0x5ad   :  { %v2029_v25 = vpop.eup %2028 }
 0x5ae   :  { %v2031_v5 = vpop.eup %2030  ;;  %v1056_v0 = vmul.f32 %v2029_v25, %v1028_v55  ;;  %v1058_v1 = vmul.f32 %v2029_v25, %v1030_v60  ;;  %v2187_v55 = vmov 1   ;;  %v2188_v60 = vmov 2  }
 0x5af   :  { %v1059_v28 = vmul.f32 %v2031_v5, %v1031_v62  ;;  %v1057_v59 = vmul.f32 %v2031_v5, %v1029_v61  ;;  %1890 = vset.pattern.permute.xlu0 %v2187_v55  ;;  %v2189_v61 = vmov 3  }
 0x5b0   :  { %v1068_v29 = vmul.f32 %v1063_v24, %v1056_v0  ;;  %v1070_v2 = vmul.f32 %v1063_v24, %v1058_v1  ;;  %1505 = vperm.xlu0 %1890, %v1275_v53  }
 0x5b1   :  { %v1069_v30 = vmul.f32 %v1067_v26, %v1057_v59  ;;  %v1071_v31 = vmul.f32 %v1067_v26, %v1059_v28 }
 0x5b2   :  { %v1080_v32 = vadd.f32 %v1075_v27, %v1068_v29  ;;  %v1082_v33 = vadd.f32 %v1075_v27, %v1070_v2 }
 0x5b3   :  { %v1081_v34 = vadd.f32 %v1079_v3, %v1069_v30  ;;  %v1083_v35 = vadd.f32 %v1079_v3, %v1071_v31 }
 0x5b4   :  { %v1084_v38 = vpack.c.bf16 %v1082_v33, %v1080_v32  ;;  %1891 = vset.pattern.permute.xlu0 %v2188_v60 }
 0x5b5   :  { %v1085_v42 = vpack.c.bf16 %v1083_v35, %v1081_v34  ;;  %1549 = vperm.xlu0 %1891, %v1274_v51  }
 0x5b7   :  { %1250 = vmatprep.mubr.bf16.mxu1 %v1085_v42 }
 0x5b8   :  { %1251 = vmatmul.mubr.bf16.vlgmr.msra.gmra.mrb[8].mxu1 %v1084_v38 }
 0x5b9   :  { %1829 = vmatpush3.bf16.msra.mxu1 %v2008_v45  ;;  %1844 = vmatprep.mubr.msk.bf16.mxu1 %vm2183_vm2, %v2182_v58 }
 0x5ba   :  { %1830 = vmatprep.subr.bf16.mxu1 %v2182_v58 }
 0x5bd   :  { %1831 = vmatpush3.bf16.msra.mxu1 %v2009_v56 }
 0x5be   :  { %1832 = vmatprep.subr.bf16.mxu1 %v2182_v58 }
 0x5c1   :  { %1833 = vmatpush3.bf16.msra.mxu1 %v2010_v57 }
 0x5c2   :  { %1834 = vmatprep.subr.bf16.mxu1 %v2182_v58 }
 0x5c5   :  { %1835 = vmatpush3.bf16.msra.mxu1 %v2011_v46 }
 0x5c6   :  { %1836 = vmatprep.subr.bf16.mxu1 %v2182_v58 }
 0x5c9   :  { %1837 = vmatpush3.bf16.msra.mxu1 %v2012_v47 }
 0x5ca   :  { %1838 = vmatprep.subr.bf16.mxu1 %v2182_v58 }
 0x5cd   :  { %1839 = vmatpush3.bf16.msra.mxu1 %v2013_v48 }
 0x5ce   :  { %1840 = vmatprep.subr.bf16.mxu1 %v2182_v58 }
 0x5d1   :  { %1841 = vmatpush3.bf16.msra.mxu1 %v2014_v49 }
 0x5d2   :  { %1842 = vmatprep.subr.bf16.mxu1 %v2182_v58  ;;  %v1276_v58 = vld [vmem:[%s2567_s7 + $0x10] sm:$0xff] }
 0x5d3   :  { %1476 = vperm.xlu1 %1888, %v1276_v58   ;;  %1557 = vperm.xlu0 %1891, %v1276_v58  }
 0x5d5   :  { %1843 = vmatpush3.bf16.msra.mxu1 %v2015_v50  ;;  %v1796_v50 = vld.sshfl [vmem:[#allocation5] sm:$0x11 pattern:$0x75316420] }
 0x5d6   :  { %v1439_v52 = vcombine.high %v1796_v50, %v1796_v50 }
 0x5d7   :  { %1889 = vset.pattern.permute.xlu1 %v2187_v55  ;;  %1894 = vset.pattern.permute.xlu0 %v2189_v61 }
 0x5d8   :  { %1501 = vperm.xlu1 %1889, %v1274_v51   ;;  %1615 = vperm.xlu0 %1894, %v1275_v53  }
 0x5dc   :  { %1509 = vperm.xlu1 %1889, %v1276_v58  }
 0x5e0   :  { %1513 = vperm.xlu1 %1889, %v2485_v54  }
 0x5e4   :  { %1892 = vset.pattern.permute.xlu1 %v2188_v60 }
 0x5e5   :  { %1553 = vperm.xlu1 %1892, %v1275_v53  }
 0x5e9   :  { %1893 = vset.pattern.permute.xlu1 %v2189_v61 }
 0x5ea   :  { %1611 = vperm.xlu1 %1893, %v1274_v51  }
 0x5ee   :  { %1619 = vperm.xlu1 %1893, %v1276_v58  }
 0x5f2   :  { %1895 = vset.pattern.permute.xlu1 %v2188_v60 }
 0x5fe   :  { %v1661_v0 = vpop.permute.xlu1 %1660  ;;  %v1599_v1 = vpop.permute.xlu0 %1598 }
 0x5ff   :  { %1864 = vpush %v1599_v1 }
 0x600   :  { %1866 = vpush %v1661_v0 }
 0x60f   :  { %v1472_v30 = vpop.permute.xlu1 %1471  ;;  %v1467_v33 = vpop.permute.xlu0 %1466 }
 0x613   :  { %v1482_v35 = vpop.permute.xlu0 %1481 }
 0x62f   :  { %v1506_v42 = vpop.permute.xlu0 %1505 }
 0x630   :  { %s2529_s7 = spop %1864 }
 0x631   :  { %s1867_s22 = spop %1866 }
 0x634   :  { %v2498_v57 = vpop.permute.xlu0 %1549 }
 0x652   :  { %v1477_v31 = vpop.permute.xlu1 %1476  ;;  %v2501_v49 = vpop.permute.xlu0 %1557 }
 0x657   :  { %v1502_v32 = vpop.permute.xlu1 %1501  ;;  %v1616_v58 = vpop.permute.xlu0 %1615 }
 0x65b   :  { %v1510_v34 = vpop.permute.xlu1 %1509 }
 0x65f   :  { %v2494_v38 = vpop.permute.xlu1 %1513 }
 0x664   :  { %v2496_v56 = vpop.permute.xlu1 %1553 }
 0x669   :  { %v1612_v48 = vpop.permute.xlu1 %1611 }
 0x66d   :  { %v1620_v53 = vpop.permute.xlu1 %1619 }
 0x68b   :  { %v1813_v62 = vpop.f32.mrb[8].mxu1 }
 0x68c   :  { %v1814_v4 = vpop.f32.mrb[9].mxu1 }
 0x68d   :  { %v1815_v6 = vadd.f32 %v1814_v4, %v1813_v62  ;;  %v1816_v7 = vpop.f32.mrb[10].mxu1 }
 0x68e   :  { %v1817_v8 = vpop.f32.mrb[11].mxu1 }
 0x68f   :  { %v1253_v9 = vadd.f32 %v1815_v6, %v1771_v63  ;;  %v1818_v10 = vadd.f32 %v1817_v8, %v1816_v7 }
 0x691   :  { %v1259_v11 = vrot.slane %v1253_v9, 4  ;;  %v1256_v37 = vadd.f32 %v1818_v10, %v1771_v63 }
 0x693   :  { %v1260_v12 = vadd.f32 %v1259_v11, %v1253_v9  ;;  %v1265_v36 = vrot.slane %v1256_v37, 4 }
 0x695   :  { %v1261_v13 = vrot.slane %v1260_v12, 2  ;;  %v1266_v14 = vadd.f32 %v1265_v36, %v1256_v37 }
 0x697   :  { %v1262_v43 = vadd.f32 %v1261_v13, %v1260_v12  ;;  %v1267_v15 = vrot.slane %v1266_v14, 2 }
 0x699   :  { %v1263_v41 = vrot.slane %v1262_v43, 1  ;;  %v1268_v16 = vadd.f32 %v1267_v15, %v1266_v14 }
 0x69b   :  { %v1264_v17 = vadd.f32 %v1263_v41, %v1262_v43  ;;  %v1269_v18 = vrot.slane %v1268_v16, 1 }
 0x69d   :  { %v1272_v19 = vmul.f32 0.125, %v1264_v17  ;;  %v1270_v20 = vadd.f32 %v1269_v18, %v1268_v16 }
 0x69f   :  { %v1278_v21 = vpack.c.bf16 %v1272_v19, %v1272_v19  ;;  %v1273_v22 = vmul.f32 0.125, %v1270_v20 }
 0x6a1   :  { %v1279_v23 = vpack.c.bf16 %v1273_v22, %v1273_v22  ;;  %v1298_v24 = vunpack.c.l.b16 %v1278_v21 }
 0x6a3   :  { %v1299_v25 = vunpack.c.l.b16 %v1279_v23 }
 0x6a5   :  { %v1301_v26 = vsel %vm1300_vm3, %v1299_v25, %v1298_v24 }
 0x6a6   :  { %v1302_v5 = vpack.c.b16 %v1301_v26, %v1301_v26 }
 0x6a8   :  { %1845 = vmatmul.mubr.bf16.vlgmr.msra.gmra.mrb[12].mxu1 %v1302_v5 }
 0x77b   :  { %v1386_v27 = vpop.f32.mrb[12].mxu1 }
 0x77c   :  { %v1395_v28 = vrot.slane %v1386_v27, %v2301_v40  ;;  %v1846_v59 = vpop.f32.mrb[13].mxu1  ;;  %v1414_v2 = vrot.slane %v1386_v27, %v2305_v44  ;;  %v2190_v44 = vmov 1966171168  }
 0x77d   :  { %v1389_v3 = vpop.f32.mrb[14].mxu1  ;;  %v1441_v45 = vunpack.c.l.s4 %v2190_v44 }
 0x77e   :  { %1401 = vbcast.lane.b32.xlu1 %v1395_v28, 264  ;;  %1397 = vbcast.lane.b32.xlu0 %v1395_v28, 256  ;;  %v1847_v29 = vpop.f32.mrb[15].mxu1 }
 0x77f   :  { %v1442_v46 = vunpack.c.0.s8 %v1441_v45 }
 0x781   :  { %v1445_v47 = vsub.s32 %v1442_v46, %v2298_v39 }
 0x782   :  { %1420 = vbcast.lane.b32.xlu1 %v1414_v2, 264  ;;  %1416 = vbcast.lane.b32.xlu0 %v1414_v2, 256 }
 0x783   :  { %v1446_v51 = vrot.slane %v1796_v50, %v1445_v47  ;;  %v1453_v55 = vrot.slane %v1439_v52, %v1445_v47 }
 0x785   :  { %v1461_v62 = vrot.slane %v1453_v55, %v2301_v40 }
 0x786   :  { %1405 = vbcast.lane.b32.xlu1 %v1395_v28, 272  ;;  %1428 = vbcast.lane.b32.xlu0 %v1414_v2, 280 }
 0x787   :  { %v1489_v39 = vmul.f32 %v1472_v30, %v1461_v62  ;;  %v1488_v8 = vmul.f32 %v1467_v33, %v1461_v62  ;;  %v1491_v18 = vmul.f32 %v1482_v35, %v1461_v62  ;;  %v1490_v19 = vmul.f32 %v1477_v31, %v1461_v62 }
 0x78a   :  { %1424 = vbcast.lane.b32.xlu1 %v1414_v2, 272  ;;  %1623 = vperm.xlu0 %1894, %v2485_v54  }
 0x78e   :  { %1409 = vbcast.lane.b32.xlu1 %v1395_v28, 280 }
 0x792   :  { %1561 = vperm.xlu1 %1895, %v2485_v54   ;;  %v1457_v54 = vrot.slane %v1446_v51, %v2301_v40 }
 0x794   :  { %v1485_v60 = vmul.f32 %v1472_v30, %v1457_v54  ;;  %v1484_v61 = vmul.f32 %v1467_v33, %v1457_v54  ;;  %v1486_v13 = vmul.f32 %v1477_v31, %v1457_v54  ;;  %v1487_v0 = vmul.f32 %v1482_v35, %v1457_v54 }
 0x7f0   :  { %v1402_v63 = vpop.permute.xlu1 %1401  ;;  %v1398_v4 = vpop.permute.xlu0 %1397 }
 0x7f1   :  { %v1493_v6 = vadd.f32 %v1485_v60, %v1402_v63  ;;  %v1492_v7 = vadd.f32 %v1484_v61, %v1398_v4 }
 0x7f3   :  { %v1517_v9 = vadd.f32 %v1506_v42, %v1493_v6  ;;  %v1516_v37 = vadd.f32 %v1502_v32, %v1492_v7 }
 0x7f4   :  { %v1421_v10 = vpop.permute.xlu1 %1420  ;;  %v1417_v11 = vpop.permute.xlu0 %1416 }
 0x7f5   :  { %v1497_v12 = vadd.f32 %v1489_v39, %v1421_v10  ;;  %v1496_v36 = vadd.f32 %v1488_v8, %v1417_v11  ;;  %v1533_v14 = vmul.f32 0.01, %v1517_v9  ;;  %v1532_v15 = vmul.f32 0.01, %v1516_v37 }
 0x7f6   :  { %vm1525_vm5 = vcmp.ge.f32.partialorder %v1517_v9, 0.0  ;;  %vm1524_vm6 = vcmp.ge.f32.partialorder %v1516_v37, 0.0 }
 0x7f7   :  { %v1521_v41 = vadd.f32 %v1506_v42, %v1497_v12  ;;  %v1520_v16 = vadd.f32 %v1502_v32, %v1496_v36  ;;  %v1541_v25 = vsel %vm1525_vm5, %v1517_v9, %v1533_v14  ;;  %v1540_v26 = vsel %vm1524_vm6, %v1516_v37, %v1532_v15 }
 0x7f8   :  { %v1406_v43 = vpop.permute.xlu1 %1405  ;;  %v1429_v40 = vpop.permute.xlu0 %1428  ;;  %v1627_v3 = vmul.f32 %v1616_v58, %v1541_v25  ;;  %v1626_v29 = vmul.f32 %v1612_v48, %v1540_v26 }
 0x7f9   :  { %v1494_v17 = vadd.f32 %v1486_v13, %v1406_v43  ;;  %vm1529_vm7 = vcmp.ge.f32.partialorder %v1521_v41, 0.0  ;;  %v1537_v20 = vmul.f32 0.01, %v1521_v41  ;;  %v1536_v21 = vmul.f32 0.01, %v1520_v16 }
 0x7fa   :  { %vm1528_vm8 = vcmp.ge.f32.partialorder %v1520_v16, 0.0  ;;  %v1499_v23 = vadd.f32 %v1491_v18, %v1429_v40  ;;  %v1635_v52 = vsel %vm189_vm4, %v1627_v3, 0.0 }
 0x7fb   :  { %v1518_v22 = vadd.f32 %v1510_v34, %v1494_v17  ;;  %v1545_v1 = vsel %vm1529_vm7, %v1521_v41, %v1537_v20  ;;  %v1544_v27 = vsel %vm1528_vm8, %v1520_v16, %v1536_v21 }
 0x7fc   :  { %v1425_v24 = vpop.permute.xlu1 %1424  ;;  %v1523_v2 = vadd.f32 %v2494_v38, %v1499_v23  ;;  %v1631_v42 = vmul.f32 %v1616_v58, %v1545_v1  ;;  %v1630_v44 = vmul.f32 %v1612_v48, %v1544_v27  ;;  %v1565_v58 = vmul.f32 %v2496_v56, %v1541_v25 }
 0x7fd   :  { %v1498_v5 = vadd.f32 %v1490_v19, %v1425_v24  ;;  %vm1526_vm9 = vcmp.ge.f32.partialorder %v1518_v22, 0.0  ;;  %v1534_v28 = vmul.f32 0.01, %v1518_v22  ;;  %v1564_v48 = vmul.f32 %v2498_v57, %v1540_v26 }
 0x7fe   :  { %v1539_v51 = vmul.f32 0.01, %v1523_v2  ;;  %vm1531_vm12 = vcmp.ge.f32.partialorder %v1523_v2, 0.0  ;;  %v1647_v54 = vsel %vm189_vm4, %v1630_v44, 0.0  ;;  %v1648_v55 = vsel %vm189_vm4, %v1631_v42, 0.0 }
 0x7ff   :  { %v1522_v59 = vadd.f32 %v1510_v34, %v1498_v5  ;;  %v1542_v31 = vsel %vm1526_vm9, %v1518_v22, %v1534_v28  ;;  %v1634_v34 = vsel %vm189_vm4, %v1626_v29, 0.0  ;;  %v1649_v63 = vadd.f32 %v1648_v55, %v1647_v54 }
 0x800   :  { %v1410_v30 = vpop.permute.xlu1 %1409  ;;  %v1628_v35 = vmul.f32 %v1620_v53, %v1542_v31  ;;  %v1547_v61 = vsel %vm1531_vm12, %v1523_v2, %v1539_v51  ;;  %v1636_v62 = vadd.f32 %v1635_v52, %v1634_v34  ;;  %v1569_v6 = vmul.f32 %v2496_v56, %v1545_v1 }
 0x801   :  { %vm1530_vm10 = vcmp.ge.f32.partialorder %v1522_v59, 0.0  ;;  %v1538_v32 = vmul.f32 0.01, %v1522_v59  ;;  %v1495_v33 = vadd.f32 %v1487_v0, %v1410_v30  ;;  %v1568_v7 = vmul.f32 %v2498_v57, %v1544_v27 }
 0x802   :  { %v1566_v11 = vmul.f32 %v2501_v49, %v1542_v31  ;;  %v1572_v43 = vsel %vm189_vm4, %v1564_v48, 0.0  ;;  %v1573_v56 = vsel %vm189_vm4, %v1565_v58, 0.0  ;;  %v1586_v15 = vsel %vm189_vm4, %v1569_v6, 0.0 }
 0x803   :  { %v1546_v45 = vsel %vm1530_vm10, %v1522_v59, %v1538_v32  ;;  %v1519_v46 = vadd.f32 %v2494_v38, %v1495_v33  ;;  %v1637_v38 = vsel %vm189_vm4, %v1628_v35, 0.0  ;;  %v1585_v57 = vsel %vm189_vm4, %v1568_v7, 0.0 }
 0x804   :  { %v1632_v47 = vmul.f32 %v1620_v53, %v1546_v45  ;;  %v1638_v9 = vadd.f32 %v1637_v38, %v1636_v62  ;;  %v1570_v37 = vmul.f32 %v2501_v49, %v1546_v45  ;;  %v1575_v17 = vsel %vm189_vm4, %v1566_v11, 0.0 }
 0x805   :  { %v1535_v50 = vmul.f32 0.01, %v1519_v46  ;;  %vm1527_vm11 = vcmp.ge.f32.partialorder %v1519_v46, 0.0  ;;  %v1574_v20 = vadd.f32 %v1573_v56, %v1572_v43  ;;  %v1587_v21 = vadd.f32 %v1586_v15, %v1585_v57 }
 0x806   :  { %v1650_v53 = vsel %vm189_vm4, %v1632_v47, 0.0  ;;  %v1588_v49 = vsel %vm189_vm4, %v1570_v37, 0.0  ;;  %v1663_v45 = vstv %s1867_s22 }
 0x807   :  { %v1543_v60 = vsel %vm1527_vm11, %v1519_v46, %v1535_v50  ;;  %v1651_v10 = vadd.f32 %v1650_v53, %v1649_v63  ;;  %v1576_v26 = vadd.f32 %v1575_v17, %v1574_v20  ;;  %v1589_v5 = vadd.f32 %v1588_v49, %v1587_v21 }
 0x809   :  { %v1624_v4 = vpop.permute.xlu0 %1623 }
 0x80a   :  { %v1629_v39 = vmul.f32 %v1624_v4, %v1543_v60  ;;  %v1633_v8 = vmul.f32 %v1624_v4, %v1547_v61 }
 0x80c   :  { %v1639_v12 = vsel %vm189_vm4, %v1629_v39, 0.0  ;;  %v1652_v36 = vsel %vm189_vm4, %v1633_v8, 0.0 }
 0x80d   :  { %v1640_v13 = vadd.f32 %v1639_v12, %v1638_v9  ;;  %v1653_v14 = vadd.f32 %v1652_v36, %v1651_v10 }
 0x80f   :  { %v1641_v41 = vrot.slane %v1640_v13, 4  ;;  %v1654_v16 = vrot.slane %v1653_v14, 4 }
 0x811   :  { %v1642_v40 = vadd.f32 %v1641_v41, %v1640_v13  ;;  %v1655_v18 = vadd.f32 %v1654_v16, %v1653_v14  ;;  %v1562_v19 = vpop.permute.xlu1 %1561 }
 0x812   :  { %v1567_v22 = vmul.f32 %v1562_v19, %v1543_v60  ;;  %v1571_v23 = vmul.f32 %v1562_v19, %v1547_v61 }
 0x813   :  { %v1643_v24 = vrot.slane %v1642_v40, 2  ;;  %v1656_v25 = vrot.slane %v1655_v18, 2 }
 0x814   :  { %v1577_v0 = vsel %vm189_vm4, %v1567_v22, 0.0  ;;  %v1590_v1 = vsel %vm189_vm4, %v1571_v23, 0.0 }
 0x815   :  { %v1644_v27 = vadd.f32 %v1643_v24, %v1642_v40  ;;  %v1657_v28 = vadd.f32 %v1656_v25, %v1655_v18  ;;  %v1578_v59 = vadd.f32 %v1577_v0, %v1576_v26  ;;  %v1591_v3 = vadd.f32 %v1590_v1, %v1589_v5 }
 0x817   :  { %v1645_v29 = vrot.slane %v1644_v27, 1  ;;  %v1658_v2 = vrot.slane %v1657_v28, 1  ;;  %v1579_v30 = vrot.slane %v1578_v59, 4  ;;  %v1592_v31 = vrot.slane %v1591_v3, 4 }
 0x819   :  { %v1646_v32 = vadd.f32 %v1645_v29, %v1644_v27  ;;  %v1659_v33 = vadd.f32 %v1658_v2, %v1657_v28  ;;  %v1580_v42 = vadd.f32 %v1579_v30, %v1578_v59  ;;  %v1593_v44 = vadd.f32 %v1592_v31, %v1591_v3 }
 0x81b   :  { %v1581_v46 = vrot.slane %v1580_v42, 2  ;;  %v1594_v35 = vrot.slane %v1593_v44, 2  ;;  %v1665_v47 = vadd.f32 %v1663_v45, %v1646_v32  ;;  %v1666_v50 = vadd.f32 %v1663_v45, %v1659_v33 }
 0x81d   :  { %v1582_v51 = vadd.f32 %v1581_v46, %v1580_v42  ;;  %v1595_v34 = vadd.f32 %v1594_v35, %v1593_v44  ;;  %v1669_v52 = vsel %vm1300_vm3, %v1666_v50, %v1665_v47 }
 0x81e   :  { %1671 = vst.msk [vmem:[#allocation11] sm:$0x3] %vm87_vm0, %v1669_v52 }
 0x81f   :  { %v1583_v54 = vrot.slane %v1582_v51, 1  ;;  %v1596_v55 = vrot.slane %v1595_v34, 1 }
 0x820   :  { %2131 = shalt.err (!%p2128_p8)
}
 0x821   :  { %s2132_s27 = scalar_lea.hbm %s2569_s9, 32 }
 0x822   :  { %p2133_p9 = scmp.ne.s32.totalorder %s2569_s9, %s2132_s27  ;;  %p2136_p10 = scmp.lt.u32.totalorder %s2132_s27, %s2569_s9 }
 0x824   :  { %p2138_p11 = pnand %p2136_p10, %p2133_p9 }
 0x826   :  { %2141 = shalt.err (!%p2138_p11)
}
 0x827   :  { %1691 = dma.vmem_to_hbm [thread:$0]  %s1689_s5, 32, %s2569_s9, [#allocation12]   ;;  %v1584_v58 = vadd.f32 %v1583_v54, %v1582_v51  ;;  %v1597_v48 = vadd.f32 %v1596_v55, %v1595_v34  ;;  %v1601_v38 = vstv %s2529_s7 }
 0x828   :  { %s2192_s3 = smov [#allocation10]  }
 0x829   :  { %s1678_s13 = sshll.u32 %s2192_s3, 4  ;;  %v1603_v53 = vadd.f32 %v1601_v38, %v1584_v58  ;;  %v1604_v60 = vadd.f32 %v1601_v38, %v1597_v48  ;;  %s1679_s13 = int_to_ptr.vmem [resolvable:$true] %s1678_s13 }
 0x82a   :  { %s2142_s14 = scalar_lea.vmem %s1679_s13, 32  ;;  %p2147_p13 = scmp.lt.s32.totalorder %s1679_s13, %s1679_s13 }
 0x82b   :  { %v1607_v61 = vsel %vm1300_vm3, %v1604_v60, %v1603_v53  ;;  %p2143_p12 = scmp.ne.s32.totalorder %s1679_s13, %s2142_s14  ;;  %p2148_p0 = scmp.lt.s32.totalorder %s2142_s14, %s2142_s14 }
 0x82c   :  { %1609 = vst.msk [vmem:[#allocation10] sm:$0x3] %vm87_vm0, %v1607_v61 }
 0x82d   :  { %p2149_p1 = por %p2148_p0, %p2147_p13 }
 0x82f   :  { %p2150_p2 = pnand %p2149_p1, %p2143_p12 }
 0x831   :  { %2153 = shalt.err (!%p2150_p2)
}
 0x832   :  { %s2154_s16 = scalar_lea.hbm %s2568_s8, 32 }
 0x833   :  { %p2155_p3 = scmp.ne.s32.totalorder %s2568_s8, %s2154_s16  ;;  %p2158_p4 = scmp.lt.u32.totalorder %s2154_s16, %s2568_s8 }
 0x835   :  { %p2160_p5 = pnand %p2158_p4, %p2155_p3 }
 0x837   :  { %2163 = shalt.err (!%p2160_p5)
}
 0x838   :  { %1681 = dma.vmem_to_hbm [thread:$0]  %s1679_s13, 32, %s2568_s8, [#allocation4]  }
 0x839   :  { %2170 = dma.done.wait [#allocation4], 32  }
 0x83a   :  { %2171 = vsyncadd [#allocation4], 4294967264 }
 0x83b   :  { %2172 = dma.done.wait [#allocation12], 32  }
 0x83c   :  { %2173 = vsyncadd [#allocation12], 4294967264 }
 0x83d   :  { %1698 = vsyncpa [#allocation3], 1 }
 0x83e   :  { %1699 = vsyncpa [#allocation6], 1 }
 0x83f   :  { %1700 = vsyncpa [#allocation9], 1 }
 0x840   :  { %1701 = vsyncpa [#allocation4], 1 }
 0x841   :  { %1702 = vsyncpa [#allocation12], 1 }

</bundles_post_ra>
